<compile_context>
chip_gen: v5e
topology: v5e:2x2
jax: 0.10.0
libtpu: 0.0.40
codegen_flags: <defaults>
</compile_context>

<pallas_src>
import numpy as np
import jax
import jax.numpy as jnp
from jax.experimental import pallas as pl
from jax.experimental.pallas import tpu as pltpu


# --------------------------- interp weights (host) -------------------------- #

def _interp_matrix_2x(S):
    """(2S, S) linear-interp matrix matching PyTorch mode='trilinear',
    scale_factor=2, align_corners=False along one axis (separable)."""
    O = 2 * S
    i = np.arange(O, dtype=np.float64)
    src = (i + 0.5) / 2.0 - 0.5
    src = np.maximum(src, 0.0)                      # PyTorch clamps negatives
    i0 = np.minimum(np.floor(src).astype(np.int64), S - 1)
    i1 = np.minimum(i0 + 1, S - 1)
    lam = src - i0
    A = np.zeros((O, S), dtype=np.float32)
    np.add.at(A, (np.arange(O), i0), (1.0 - lam).astype(np.float32))
    np.add.at(A, (np.arange(O), i1), lam.astype(np.float32))
    return A


# ------------------------------- fused kernel ------------------------------ #

def _vuconv_fused_kernel(xm_ref, xc_ref, xp_ref, ah_ref, awt_ref,
                         w_ref, b_ref, o_ref):
    """One grid step == one (n, d) pair.

    xm/xc/xp : (Cin, H, W)       input depth planes d-1, d, d+1 (edge clamped)
    ah       : (2H, H)           interp matrix along H (VMEM resident)
    awt      : (W, 2W)           interp matrix along W, transposed
    w        : (Cout, Cin) SMEM  conv weights (scalar access)
    b        : (Cout,)     SMEM  conv bias
    o        : (Cout, 2, 2H, 2W) output depth planes (2d, 2d+1)
    """
    Cin = xm_ref.shape[0]
    Cout = o_ref.shape[0]

    def lrelu(t):
        return jnp.where(t >= 0, t, 0.01 * t)

    # LeakyReLU per input channel, then blend along D in the Cin domain.
    # (The 1x1x1 conv is linear, so blending before it is exact:
    #    out depth 2d   = 0.75*y[d] + 0.25*y[d-1]
    #    out depth 2d+1 = 0.75*y[d] + 0.25*y[d+1], edges clamped.)
    acc0 = [None] * Cout            # conv accumulators for out depth 2d
    acc1 = [None] * Cout            # conv accumulators for out depth 2d+1
    for c in range(Cin):
        xc = lrelu(xc_ref[c])
        p0 = 0.75 * xc + 0.25 * lrelu(xm_ref[c])        # (H, W)
        p1 = 0.75 * xc + 0.25 * lrelu(xp_ref[c])        # (H, W)
        for o in range(Cout):
            wv = w_ref[o, c]                            # SMEM scalar
            t0 = p0 * wv
            t1 = p1 * wv
            acc0[o] = t0 if acc0[o] is None else acc0[o] + t0
            acc1[o] = t1 if acc1[o] is None else acc1[o] + t1

    ah = ah_ref[...]                                    # (2H, H)
    awt = awt_ref[...]                                  # (W, 2W)
    for o in range(Cout):
        bo = b_ref[o]                                   # SMEM scalar
        y0 = acc0[o] + bo                               # (H, W)
        y1 = acc1[o] + bo
        u0 = jnp.dot(ah, y0, preferred_element_type=jnp.float32)   # (2H, W)
        u0 = jnp.dot(u0, awt, preferred_element_type=jnp.float32)  # (2H, 2W)
        u1 = jnp.dot(ah, y1, preferred_element_type=jnp.float32)
        u1 = jnp.dot(u1, awt, preferred_element_type=jnp.float32)
        o_ref[o, 0, :, :] = u0
        o_ref[o, 1, :, :] = u1


# --------------------------------- forward --------------------------------- #

def vuconv_forward(x_ncdhw, w_mat, bias):
    """x: (N, Cin, D, H, W) f32 -> (N, Cout, 2D, 2H, 2W) f32.

    w_mat = ConvTranspose3d(in, out, 1).weight[:, :, 0, 0, 0]   (shape (Cin, Cout))
    bias  = ConvTranspose3d bias                                 (shape (Cout,))
    """
    N, Cin, D, H, W = x_ncdhw.shape
    Cout = w_mat.shape[1]

    a_h = jnp.asarray(_interp_matrix_2x(H))             # (2H, H)
    a_wt = jnp.asarray(_interp_matrix_2x(W).T)          # (W, 2W)
    w_oc = jnp.asarray(w_mat).T                         # (Cout, Cin)
    b = jnp.asarray(bias)

    def plane_spec(index_map):
        # N and D squeezed out; kernel sees (Cin, H, W).
        return pl.BlockSpec((None, Cin, None, H, W), index_map)

    return pl.pallas_call(
        _vuconv_fused_kernel,
        out_shape=jax.ShapeDtypeStruct((N, Cout, 2 * D, 2 * H, 2 * W),
                                       jnp.float32),
        grid=(N, D),
        in_specs=[
            plane_spec(lambda n, d: (n, 0, jnp.maximum(d - 1, 0), 0, 0)),
            plane_spec(lambda n, d: (n, 0, d, 0, 0)),
            plane_spec(lambda n, d: (n, 0, jnp.minimum(d + 1, D - 1), 0, 0)),
            pl.BlockSpec((2 * H, H), lambda n, d: (0, 0)),
            pl.BlockSpec((W, 2 * W), lambda n, d: (0, 0)),
            pl.BlockSpec(memory_space=pltpu.MemorySpace.SMEM),
            pl.BlockSpec(memory_space=pltpu.MemorySpace.SMEM),
        ],
        out_specs=pl.BlockSpec((None, Cout, 2, 2 * H, 2 * W),
                               lambda n, d: (n, 0, d, 0, 0)),
        compiler_params=pltpu.CompilerParams(
            dimension_semantics=("parallel", "parallel"),
            vmem_limit_bytes=32 * 1024 * 1024),
    )(x_ncdhw, x_ncdhw, x_ncdhw, a_h, a_wt, w_oc, b)


# ------------------------- host-side float64 reference ---------------------- #

def _vuconv_reference_np(x, w_mat, bias):
    x = np.asarray(x, dtype=np.float64)
    w = np.asarray(w_mat, dtype=np.float64)
    b = np.asarray(bias, dtype=np.float64)
    _, _, D, H, W = x.shape
    y = np.where(x >= 0, x, 0.01 * x)
    y = np.einsum('ncdhw,co->nodhw', y, w) + b[None, :, None, None, None]
    y = np.einsum('ed,nodhw->noehw', _interp_matrix_2x(D).astype(np.float64), y)
    y = np.einsum('fh,noehw->noefw', _interp_matrix_2x(H).astype(np.float64), y)
    y = np.einsum('gw,noefw->noefg', _interp_matrix_2x(W).astype(np.float64), y)
    return y


# ----------------------------------- main ----------------------------------- #

if __name__ == "__main__":
    key = jax.random.PRNGKey(0)
    kx, kw, kb = jax.random.split(key, 3)

    N, Cin, Cout, D, H, W = 2, 4, 8, 8, 16, 16
    x = jax.random.normal(kx, (N, Cin, D, H, W), dtype=jnp.float32)

    # ConvTranspose3d(in, out, 1) parameters: weight (Cin, Cout), bias (Cout,)
    bound = 1.0 / np.sqrt(Cin)
    w_mat = jax.random.uniform(kw, (Cin, Cout), minval=-bound, maxval=bound,
                               dtype=jnp.float32)
    bias = jax.random.uniform(kb, (Cout,), minval=-bound, maxval=bound,
                              dtype=jnp.float32)

    out = jax.jit(vuconv_forward)(x, w_mat, bias)
    out = jax.block_until_ready(out)
    assert out.shape == (N, Cout, 2 * D, 2 * H, 2 * W), out.shape
    assert out.dtype == jnp.float32

    ref = _vuconv_reference_np(np.asarray(x), np.asarray(w_mat), np.asarray(bias))
    max_err = float(np.max(np.abs(np.asarray(out, dtype=np.float64) - ref)))
    assert max_err < 2e-2, f"max abs err {max_err}"

    print("KERNEL_OK")
</pallas_src>

<mosaic_0001>
module attributes {stable_mosaic.version = 11 : i64} {
  func.func @_vuconv_fused_kernel(%arg0: i32, %arg1: i32, %arg2: memref<1x4x1x16x16xf32, #tpu.memory_space<vmem>>, %arg3: memref<1x4x1x16x16xf32, #tpu.memory_space<vmem>>, %arg4: memref<1x4x1x16x16xf32, #tpu.memory_space<vmem>>, %arg5: memref<32x16xf32, #tpu.memory_space<vmem>>, %arg6: memref<16x32xf32, #tpu.memory_space<vmem>>, %arg7: memref<8x4xf32, #tpu.memory_space<smem>>, %arg8: memref<8xf32, #tpu.memory_space<smem>>, %arg9: memref<1x8x2x32x32xf32, #tpu.memory_space<vmem>>) attributes {dimension_semantics = [#tpu.dimension_semantics<parallel>, #tpu.dimension_semantics<parallel>], iteration_bounds = array<i64: 2, 8>, scalar_prefetch = 0 : i64, scratch_operands = 0 : i64, tpu.core_type = #tpu.core_type<tc>, window_params = [{transform_indices = @transform_0, window_bounds = array<i64: 1, 4, 1, 16, 16>}, {transform_indices = @transform_1, window_bounds = array<i64: 1, 4, 1, 16, 16>}, {transform_indices = @transform_2, window_bounds = array<i64: 1, 4, 1, 16, 16>}, {pipeline_mode = #tpu.pipeline_mode<synchronous>, transform_indices = @transform_3, window_bounds = array<i64: 32, 16>}, {pipeline_mode = #tpu.pipeline_mode<synchronous>, transform_indices = @transform_4, window_bounds = array<i64: 16, 32>}, {transform_indices = @transform_5, window_bounds = array<i64: 8, 4>}, {transform_indices = @transform_6, window_bounds = array<i64: 8>}, {transform_indices = @transform_7, window_bounds = array<i64: 1, 8, 2, 32, 32>}]} {
    %c0 = arith.constant 0 : index
    %c0_0 = arith.constant 0 : index
    %c0_1 = arith.constant 0 : index
    %c0_2 = arith.constant 0 : index
    %c0_3 = arith.constant 0 : index
    %0 = vector.load %arg3[%c0, %c0_0, %c0_1, %c0_2, %c0_3] : memref<1x4x1x16x16xf32, #tpu.memory_space<vmem>>, vector<1x1x1x16x16xf32>
    %1 = vector.shape_cast %0 : vector<1x1x1x16x16xf32> to vector<16x16xf32>
    %cst = arith.constant 0.000000e+00 : f32
    %2 = vector.broadcast %cst : f32 to vector<16x16xf32>
    %3 = arith.cmpf oge, %1, %2 : vector<16x16xf32>
    %cst_4 = arith.constant 0.00999999977 : f32
    %4 = vector.broadcast %cst_4 : f32 to vector<16x16xf32>
    %5 = arith.mulf %4, %1 : vector<16x16xf32>
    %6 = arith.select %3, %1, %5 : vector<16x16xi1>, vector<16x16xf32>
    %cst_5 = arith.constant 7.500000e-01 : f32
    %7 = vector.broadcast %cst_5 : f32 to vector<16x16xf32>
    %8 = arith.mulf %7, %6 : vector<16x16xf32>
    %c0_6 = arith.constant 0 : index
    %c0_7 = arith.constant 0 : index
    %c0_8 = arith.constant 0 : index
    %c0_9 = arith.constant 0 : index
    %c0_10 = arith.constant 0 : index
    %9 = vector.load %arg2[%c0_6, %c0_7, %c0_8, %c0_9, %c0_10] : memref<1x4x1x16x16xf32, #tpu.memory_space<vmem>>, vector<1x1x1x16x16xf32>
    %10 = vector.shape_cast %9 : vector<1x1x1x16x16xf32> to vector<16x16xf32>
    %cst_11 = arith.constant 0.000000e+00 : f32
    %11 = vector.broadcast %cst_11 : f32 to vector<16x16xf32>
    %12 = arith.cmpf oge, %10, %11 : vector<16x16xf32>
    %cst_12 = arith.constant 0.00999999977 : f32
    %13 = vector.broadcast %cst_12 : f32 to vector<16x16xf32>
    %14 = arith.mulf %13, %10 : vector<16x16xf32>
    %15 = arith.select %12, %10, %14 : vector<16x16xi1>, vector<16x16xf32>
    %cst_13 = arith.constant 2.500000e-01 : f32
    %16 = vector.broadcast %cst_13 : f32 to vector<16x16xf32>
    %17 = arith.mulf %16, %15 : vector<16x16xf32>
    %18 = arith.addf %8, %17 : vector<16x16xf32>
    %cst_14 = arith.constant 7.500000e-01 : f32
    %19 = vector.broadcast %cst_14 : f32 to vector<16x16xf32>
    %20 = arith.mulf %19, %6 : vector<16x16xf32>
    %c0_15 = arith.constant 0 : index
    %c0_16 = arith.constant 0 : index
    %c0_17 = arith.constant 0 : index
    %c0_18 = arith.constant 0 : index
    %c0_19 = arith.constant 0 : index
    %21 = vector.load %arg4[%c0_15, %c0_16, %c0_17, %c0_18, %c0_19] : memref<1x4x1x16x16xf32, #tpu.memory_space<vmem>>, vector<1x1x1x16x16xf32>
    %22 = vector.shape_cast %21 : vector<1x1x1x16x16xf32> to vector<16x16xf32>
    %cst_20 = arith.constant 0.000000e+00 : f32
    %23 = vector.broadcast %cst_20 : f32 to vector<16x16xf32>
    %24 = arith.cmpf oge, %22, %23 : vector<16x16xf32>
    %cst_21 = arith.constant 0.00999999977 : f32
    %25 = vector.broadcast %cst_21 : f32 to vector<16x16xf32>
    %26 = arith.mulf %25, %22 : vector<16x16xf32>
    %27 = arith.select %24, %22, %26 : vector<16x16xi1>, vector<16x16xf32>
    %cst_22 = arith.constant 2.500000e-01 : f32
    %28 = vector.broadcast %cst_22 : f32 to vector<16x16xf32>
    %29 = arith.mulf %28, %27 : vector<16x16xf32>
    %30 = arith.addf %20, %29 : vector<16x16xf32>
    %c0_23 = arith.constant 0 : index
    %c0_24 = arith.constant 0 : index
    %31 = memref.load %arg7[%c0_23, %c0_24] : memref<8x4xf32, #tpu.memory_space<smem>>
    %32 = vector.broadcast %31 : f32 to vector<16x16xf32>
    %33 = arith.mulf %18, %32 : vector<16x16xf32>
    %34 = vector.broadcast %31 : f32 to vector<16x16xf32>
    %35 = arith.mulf %30, %34 : vector<16x16xf32>
    %c1 = arith.constant 1 : index
    %c0_25 = arith.constant 0 : index
    %36 = memref.load %arg7[%c1, %c0_25] : memref<8x4xf32, #tpu.memory_space<smem>>
    %37 = vector.broadcast %36 : f32 to vector<16x16xf32>
    %38 = arith.mulf %18, %37 : vector<16x16xf32>
    %39 = vector.broadcast %36 : f32 to vector<16x16xf32>
    %40 = arith.mulf %30, %39 : vector<16x16xf32>
    %c2 = arith.constant 2 : index
    %c0_26 = arith.constant 0 : index
    %41 = memref.load %arg7[%c2, %c0_26] : memref<8x4xf32, #tpu.memory_space<smem>>
    %42 = vector.broadcast %41 : f32 to vector<16x16xf32>
    %43 = arith.mulf %18, %42 : vector<16x16xf32>
    %44 = vector.broadcast %41 : f32 to vector<16x16xf32>
    %45 = arith.mulf %30, %44 : vector<16x16xf32>
    %c3 = arith.constant 3 : index
    %c0_27 = arith.constant 0 : index
    %46 = memref.load %arg7[%c3, %c0_27] : memref<8x4xf32, #tpu.memory_space<smem>>
    %47 = vector.broadcast %46 : f32 to vector<16x16xf32>
    %48 = arith.mulf %18, %47 : vector<16x16xf32>
    %49 = vector.broadcast %46 : f32 to vector<16x16xf32>
    %50 = arith.mulf %30, %49 : vector<16x16xf32>
    %c4 = arith.constant 4 : index
    %c0_28 = arith.constant 0 : index
    %51 = memref.load %arg7[%c4, %c0_28] : memref<8x4xf32, #tpu.memory_space<smem>>
    %52 = vector.broadcast %51 : f32 to vector<16x16xf32>
    %53 = arith.mulf %18, %52 : vector<16x16xf32>
    %54 = vector.broadcast %51 : f32 to vector<16x16xf32>
    %55 = arith.mulf %30, %54 : vector<16x16xf32>
    %c5 = arith.constant 5 : index
    %c0_29 = arith.constant 0 : index
    %56 = memref.load %arg7[%c5, %c0_29] : memref<8x4xf32, #tpu.memory_space<smem>>
    %57 = vector.broadcast %56 : f32 to vector<16x16xf32>
    %58 = arith.mulf %18, %57 : vector<16x16xf32>
    %59 = vector.broadcast %56 : f32 to vector<16x16xf32>
    %60 = arith.mulf %30, %59 : vector<16x16xf32>
    %c6 = arith.constant 6 : index
    %c0_30 = arith.constant 0 : index
    %61 = memref.load %arg7[%c6, %c0_30] : memref<8x4xf32, #tpu.memory_space<smem>>
    %62 = vector.broadcast %61 : f32 to vector<16x16xf32>
    %63 = arith.mulf %18, %62 : vector<16x16xf32>
    %64 = vector.broadcast %61 : f32 to vector<16x16xf32>
    %65 = arith.mulf %30, %64 : vector<16x16xf32>
    %c7 = arith.constant 7 : index
    %c0_31 = arith.constant 0 : index
    %66 = memref.load %arg7[%c7, %c0_31] : memref<8x4xf32, #tpu.memory_space<smem>>
    %67 = vector.broadcast %66 : f32 to vector<16x16xf32>
    %68 = arith.mulf %18, %67 : vector<16x16xf32>
    %69 = vector.broadcast %66 : f32 to vector<16x16xf32>
    %70 = arith.mulf %30, %69 : vector<16x16xf32>
    %c0_32 = arith.constant 0 : index
    %c1_33 = arith.constant 1 : index
    %c0_34 = arith.constant 0 : index
    %c0_35 = arith.constant 0 : index
    %c0_36 = arith.constant 0 : index
    %71 = vector.load %arg3[%c0_32, %c1_33, %c0_34, %c0_35, %c0_36] : memref<1x4x1x16x16xf32, #tpu.memory_space<vmem>>, vector<1x1x1x16x16xf32>
    %72 = vector.shape_cast %71 : vector<1x1x1x16x16xf32> to vector<16x16xf32>
    %cst_37 = arith.constant 0.000000e+00 : f32
    %73 = vector.broadcast %cst_37 : f32 to vector<16x16xf32>
    %74 = arith.cmpf oge, %72, %73 : vector<16x16xf32>
    %cst_38 = arith.constant 0.00999999977 : f32
    %75 = vector.broadcast %cst_38 : f32 to vector<16x16xf32>
    %76 = arith.mulf %75, %72 : vector<16x16xf32>
    %77 = arith.select %74, %72, %76 : vector<16x16xi1>, vector<16x16xf32>
    %cst_39 = arith.constant 7.500000e-01 : f32
    %78 = vector.broadcast %cst_39 : f32 to vector<16x16xf32>
    %79 = arith.mulf %78, %77 : vector<16x16xf32>
    %c0_40 = arith.constant 0 : index
    %c1_41 = arith.constant 1 : index
    %c0_42 = arith.constant 0 : index
    %c0_43 = arith.constant 0 : index
    %c0_44 = arith.constant 0 : index
    %80 = vector.load %arg2[%c0_40, %c1_41, %c0_42, %c0_43, %c0_44] : memref<1x4x1x16x16xf32, #tpu.memory_space<vmem>>, vector<1x1x1x16x16xf32>
    %81 = vector.shape_cast %80 : vector<1x1x1x16x16xf32> to vector<16x16xf32>
    %cst_45 = arith.constant 0.000000e+00 : f32
    %82 = vector.broadcast %cst_45 : f32 to vector<16x16xf32>
    %83 = arith.cmpf oge, %81, %82 : vector<16x16xf32>
    %cst_46 = arith.constant 0.00999999977 : f32
    %84 = vector.broadcast %cst_46 : f32 to vector<16x16xf32>
    %85 = arith.mulf %84, %81 : vector<16x16xf32>
    %86 = arith.select %83, %81, %85 : vector<16x16xi1>, vector<16x16xf32>
    %cst_47 = arith.constant 2.500000e-01 : f32
    %87 = vector.broadcast %cst_47 : f32 to vector<16x16xf32>
    %88 = arith.mulf %87, %86 : vector<16x16xf32>
    %89 = arith.addf %79, %88 : vector<16x16xf32>
    %cst_48 = arith.constant 7.500000e-01 : f32
    %90 = vector.broadcast %cst_48 : f32 to vector<16x16xf32>
    %91 = arith.mulf %90, %77 : vector<16x16xf32>
    %c0_49 = arith.constant 0 : index
    %c1_50 = arith.constant 1 : index
    %c0_51 = arith.constant 0 : index
    %c0_52 = arith.constant 0 : index
    %c0_53 = arith.constant 0 : index
    %92 = vector.load %arg4[%c0_49, %c1_50, %c0_51, %c0_52, %c0_53] : memref<1x4x1x16x16xf32, #tpu.memory_space<vmem>>, vector<1x1x1x16x16xf32>
    %93 = vector.shape_cast %92 : vector<1x1x1x16x16xf32> to vector<16x16xf32>
    %cst_54 = arith.constant 0.000000e+00 : f32
    %94 = vector.broadcast %cst_54 : f32 to vector<16x16xf32>
    %95 = arith.cmpf oge, %93, %94 : vector<16x16xf32>
    %cst_55 = arith.constant 0.00999999977 : f32
    %96 = vector.broadcast %cst_55 : f32 to vector<16x16xf32>
    %97 = arith.mulf %96, %93 : vector<16x16xf32>
    %98 = arith.select %95, %93, %97 : vector<16x16xi1>, vector<16x16xf32>
    %cst_56 = arith.constant 2.500000e-01 : f32
    %99 = vector.broadcast %cst_56 : f32 to vector<16x16xf32>
    %100 = arith.mulf %99, %98 : vector<16x16xf32>
    %101 = arith.addf %91, %100 : vector<16x16xf32>
    %c0_57 = arith.constant 0 : index
    %c1_58 = arith.constant 1 : index
    %102 = memref.load %arg7[%c0_57, %c1_58] : memref<8x4xf32, #tpu.memory_space<smem>>
    %103 = vector.broadcast %102 : f32 to vector<16x16xf32>
    %104 = arith.mulf %89, %103 : vector<16x16xf32>
    %105 = vector.broadcast %102 : f32 to vector<16x16xf32>
    %106 = arith.mulf %101, %105 : vector<16x16xf32>
    %107 = arith.addf %33, %104 : vector<16x16xf32>
    %108 = arith.addf %35, %106 : vector<16x16xf32>
    %c1_59 = arith.constant 1 : index
    %c1_60 = arith.constant 1 : index
    %109 = memref.load %arg7[%c1_59, %c1_60] : memref<8x4xf32, #tpu.memory_space<smem>>
    %110 = vector.broadcast %109 : f32 to vector<16x16xf32>
    %111 = arith.mulf %89, %110 : vector<16x16xf32>
    %112 = vector.broadcast %109 : f32 to vector<16x16xf32>
    %113 = arith.mulf %101, %112 : vector<16x16xf32>
    %114 = arith.addf %38, %111 : vector<16x16xf32>
    %115 = arith.addf %40, %113 : vector<16x16xf32>
    %c2_61 = arith.constant 2 : index
    %c1_62 = arith.constant 1 : index
    %116 = memref.load %arg7[%c2_61, %c1_62] : memref<8x4xf32, #tpu.memory_space<smem>>
    %117 = vector.broadcast %116 : f32 to vector<16x16xf32>
    %118 = arith.mulf %89, %117 : vector<16x16xf32>
    %119 = vector.broadcast %116 : f32 to vector<16x16xf32>
    %120 = arith.mulf %101, %119 : vector<16x16xf32>
    %121 = arith.addf %43, %118 : vector<16x16xf32>
    %122 = arith.addf %45, %120 : vector<16x16xf32>
    %c3_63 = arith.constant 3 : index
    %c1_64 = arith.constant 1 : index
    %123 = memref.load %arg7[%c3_63, %c1_64] : memref<8x4xf32, #tpu.memory_space<smem>>
    %124 = vector.broadcast %123 : f32 to vector<16x16xf32>
    %125 = arith.mulf %89, %124 : vector<16x16xf32>
    %126 = vector.broadcast %123 : f32 to vector<16x16xf32>
    %127 = arith.mulf %101, %126 : vector<16x16xf32>
    %128 = arith.addf %48, %125 : vector<16x16xf32>
    %129 = arith.addf %50, %127 : vector<16x16xf32>
    %c4_65 = arith.constant 4 : index
    %c1_66 = arith.constant 1 : index
    %130 = memref.load %arg7[%c4_65, %c1_66] : memref<8x4xf32, #tpu.memory_space<smem>>
    %131 = vector.broadcast %130 : f32 to vector<16x16xf32>
    %132 = arith.mulf %89, %131 : vector<16x16xf32>
    %133 = vector.broadcast %130 : f32 to vector<16x16xf32>
    %134 = arith.mulf %101, %133 : vector<16x16xf32>
    %135 = arith.addf %53, %132 : vector<16x16xf32>
    %136 = arith.addf %55, %134 : vector<16x16xf32>
    %c5_67 = arith.constant 5 : index
    %c1_68 = arith.constant 1 : index
    %137 = memref.load %arg7[%c5_67, %c1_68] : memref<8x4xf32, #tpu.memory_space<smem>>
    %138 = vector.broadcast %137 : f32 to vector<16x16xf32>
    %139 = arith.mulf %89, %138 : vector<16x16xf32>
    %140 = vector.broadcast %137 : f32 to vector<16x16xf32>
    %141 = arith.mulf %101, %140 : vector<16x16xf32>
    %142 = arith.addf %58, %139 : vector<16x16xf32>
    %143 = arith.addf %60, %141 : vector<16x16xf32>
    %c6_69 = arith.constant 6 : index
    %c1_70 = arith.constant 1 : index
    %144 = memref.load %arg7[%c6_69, %c1_70] : memref<8x4xf32, #tpu.memory_space<smem>>
    %145 = vector.broadcast %144 : f32 to vector<16x16xf32>
    %146 = arith.mulf %89, %145 : vector<16x16xf32>
    %147 = vector.broadcast %144 : f32 to vector<16x16xf32>
    %148 = arith.mulf %101, %147 : vector<16x16xf32>
    %149 = arith.addf %63, %146 : vector<16x16xf32>
    %150 = arith.addf %65, %148 : vector<16x16xf32>
    %c7_71 = arith.constant 7 : index
    %c1_72 = arith.constant 1 : index
    %151 = memref.load %arg7[%c7_71, %c1_72] : memref<8x4xf32, #tpu.memory_space<smem>>
    %152 = vector.broadcast %151 : f32 to vector<16x16xf32>
    %153 = arith.mulf %89, %152 : vector<16x16xf32>
    %154 = vector.broadcast %151 : f32 to vector<16x16xf32>
    %155 = arith.mulf %101, %154 : vector<16x16xf32>
    %156 = arith.addf %68, %153 : vector<16x16xf32>
    %157 = arith.addf %70, %155 : vector<16x16xf32>
    %c0_73 = arith.constant 0 : index
    %c2_74 = arith.constant 2 : index
    %c0_75 = arith.constant 0 : index
    %c0_76 = arith.constant 0 : index
    %c0_77 = arith.constant 0 : index
    %158 = vector.load %arg3[%c0_73, %c2_74, %c0_75, %c0_76, %c0_77] : memref<1x4x1x16x16xf32, #tpu.memory_space<vmem>>, vector<1x1x1x16x16xf32>
    %159 = vector.shape_cast %158 : vector<1x1x1x16x16xf32> to vector<16x16xf32>
    %cst_78 = arith.constant 0.000000e+00 : f32
    %160 = vector.broadcast %cst_78 : f32 to vector<16x16xf32>
    %161 = arith.cmpf oge, %159, %160 : vector<16x16xf32>
    %cst_79 = arith.constant 0.00999999977 : f32
    %162 = vector.broadcast %cst_79 : f32 to vector<16x16xf32>
    %163 = arith.mulf %162, %159 : vector<16x16xf32>
    %164 = arith.select %161, %159, %163 : vector<16x16xi1>, vector<16x16xf32>
    %cst_80 = arith.constant 7.500000e-01 : f32
    %165 = vector.broadcast %cst_80 : f32 to vector<16x16xf32>
    %166 = arith.mulf %165, %164 : vector<16x16xf32>
    %c0_81 = arith.constant 0 : index
    %c2_82 = arith.constant 2 : index
    %c0_83 = arith.constant 0 : index
    %c0_84 = arith.constant 0 : index
    %c0_85 = arith.constant 0 : index
    %167 = vector.load %arg2[%c0_81, %c2_82, %c0_83, %c0_84, %c0_85] : memref<1x4x1x16x16xf32, #tpu.memory_space<vmem>>, vector<1x1x1x16x16xf32>
    %168 = vector.shape_cast %167 : vector<1x1x1x16x16xf32> to vector<16x16xf32>
    %cst_86 = arith.constant 0.000000e+00 : f32
    %169 = vector.broadcast %cst_86 : f32 to vector<16x16xf32>
    %170 = arith.cmpf oge, %168, %169 : vector<16x16xf32>
    %cst_87 = arith.constant 0.00999999977 : f32
    %171 = vector.broadcast %cst_87 : f32 to vector<16x16xf32>
    %172 = arith.mulf %171, %168 : vector<16x16xf32>
    %173 = arith.select %170, %168, %172 : vector<16x16xi1>, vector<16x16xf32>
    %cst_88 = arith.constant 2.500000e-01 : f32
    %174 = vector.broadcast %cst_88 : f32 to vector<16x16xf32>
    %175 = arith.mulf %174, %173 : vector<16x16xf32>
    %176 = arith.addf %166, %175 : vector<16x16xf32>
    %cst_89 = arith.constant 7.500000e-01 : f32
    %177 = vector.broadcast %cst_89 : f32 to vector<16x16xf32>
    %178 = arith.mulf %177, %164 : vector<16x16xf32>
    %c0_90 = arith.constant 0 : index
    %c2_91 = arith.constant 2 : index
    %c0_92 = arith.constant 0 : index
    %c0_93 = arith.constant 0 : index
    %c0_94 = arith.constant 0 : index
    %179 = vector.load %arg4[%c0_90, %c2_91, %c0_92, %c0_93, %c0_94] : memref<1x4x1x16x16xf32, #tpu.memory_space<vmem>>, vector<1x1x1x16x16xf32>
    %180 = vector.shape_cast %179 : vector<1x1x1x16x16xf32> to vector<16x16xf32>
    %cst_95 = arith.constant 0.000000e+00 : f32
    %181 = vector.broadcast %cst_95 : f32 to vector<16x16xf32>
    %182 = arith.cmpf oge, %180, %181 : vector<16x16xf32>
    %cst_96 = arith.constant 0.00999999977 : f32
    %183 = vector.broadcast %cst_96 : f32 to vector<16x16xf32>
    %184 = arith.mulf %183, %180 : vector<16x16xf32>
    %185 = arith.select %182, %180, %184 : vector<16x16xi1>, vector<16x16xf32>
    %cst_97 = arith.constant 2.500000e-01 : f32
    %186 = vector.broadcast %cst_97 : f32 to vector<16x16xf32>
    %187 = arith.mulf %186, %185 : vector<16x16xf32>
    %188 = arith.addf %178, %187 : vector<16x16xf32>
    %c0_98 = arith.constant 0 : index
    %c2_99 = arith.constant 2 : index
    %189 = memref.load %arg7[%c0_98, %c2_99] : memref<8x4xf32, #tpu.memory_space<smem>>
    %190 = vector.broadcast %189 : f32 to vector<16x16xf32>
    %191 = arith.mulf %176, %190 : vector<16x16xf32>
    %192 = vector.broadcast %189 : f32 to vector<16x16xf32>
    %193 = arith.mulf %188, %192 : vector<16x16xf32>
    %194 = arith.addf %107, %191 : vector<16x16xf32>
    %195 = arith.addf %108, %193 : vector<16x16xf32>
    %c1_100 = arith.constant 1 : index
    %c2_101 = arith.constant 2 : index
    %196 = memref.load %arg7[%c1_100, %c2_101] : memref<8x4xf32, #tpu.memory_space<smem>>
    %197 = vector.broadcast %196 : f32 to vector<16x16xf32>
    %198 = arith.mulf %176, %197 : vector<16x16xf32>
    %199 = vector.broadcast %196 : f32 to vector<16x16xf32>
    %200 = arith.mulf %188, %199 : vector<16x16xf32>
    %201 = arith.addf %114, %198 : vector<16x16xf32>
    %202 = arith.addf %115, %200 : vector<16x16xf32>
    %c2_102 = arith.constant 2 : index
    %c2_103 = arith.constant 2 : index
    %203 = memref.load %arg7[%c2_102, %c2_103] : memref<8x4xf32, #tpu.memory_space<smem>>
    %204 = vector.broadcast %203 : f32 to vector<16x16xf32>
    %205 = arith.mulf %176, %204 : vector<16x16xf32>
    %206 = vector.broadcast %203 : f32 to vector<16x16xf32>
    %207 = arith.mulf %188, %206 : vector<16x16xf32>
    %208 = arith.addf %121, %205 : vector<16x16xf32>
    %209 = arith.addf %122, %207 : vector<16x16xf32>
    %c3_104 = arith.constant 3 : index
    %c2_105 = arith.constant 2 : index
    %210 = memref.load %arg7[%c3_104, %c2_105] : memref<8x4xf32, #tpu.memory_space<smem>>
    %211 = vector.broadcast %210 : f32 to vector<16x16xf32>
    %212 = arith.mulf %176, %211 : vector<16x16xf32>
    %213 = vector.broadcast %210 : f32 to vector<16x16xf32>
    %214 = arith.mulf %188, %213 : vector<16x16xf32>
    %215 = arith.addf %128, %212 : vector<16x16xf32>
    %216 = arith.addf %129, %214 : vector<16x16xf32>
    %c4_106 = arith.constant 4 : index
    %c2_107 = arith.constant 2 : index
    %217 = memref.load %arg7[%c4_106, %c2_107] : memref<8x4xf32, #tpu.memory_space<smem>>
    %218 = vector.broadcast %217 : f32 to vector<16x16xf32>
    %219 = arith.mulf %176, %218 : vector<16x16xf32>
    %220 = vector.broadcast %217 : f32 to vector<16x16xf32>
    %221 = arith.mulf %188, %220 : vector<16x16xf32>
    %222 = arith.addf %135, %219 : vector<16x16xf32>
    %223 = arith.addf %136, %221 : vector<16x16xf32>
    %c5_108 = arith.constant 5 : index
    %c2_109 = arith.constant 2 : index
    %224 = memref.load %arg7[%c5_108, %c2_109] : memref<8x4xf32, #tpu.memory_space<smem>>
    %225 = vector.broadcast %224 : f32 to vector<16x16xf32>
    %226 = arith.mulf %176, %225 : vector<16x16xf32>
    %227 = vector.broadcast %224 : f32 to vector<16x16xf32>
    %228 = arith.mulf %188, %227 : vector<16x16xf32>
    %229 = arith.addf %142, %226 : vector<16x16xf32>
    %230 = arith.addf %143, %228 : vector<16x16xf32>
    %c6_110 = arith.constant 6 : index
    %c2_111 = arith.constant 2 : index
    %231 = memref.load %arg7[%c6_110, %c2_111] : memref<8x4xf32, #tpu.memory_space<smem>>
    %232 = vector.broadcast %231 : f32 to vector<16x16xf32>
    %233 = arith.mulf %176, %232 : vector<16x16xf32>
    %234 = vector.broadcast %231 : f32 to vector<16x16xf32>
    %235 = arith.mulf %188, %234 : vector<16x16xf32>
    %236 = arith.addf %149, %233 : vector<16x16xf32>
    %237 = arith.addf %150, %235 : vector<16x16xf32>
    %c7_112 = arith.constant 7 : index
    %c2_113 = arith.constant 2 : index
    %238 = memref.load %arg7[%c7_112, %c2_113] : memref<8x4xf32, #tpu.memory_space<smem>>
    %239 = vector.broadcast %238 : f32 to vector<16x16xf32>
    %240 = arith.mulf %176, %239 : vector<16x16xf32>
    %241 = vector.broadcast %238 : f32 to vector<16x16xf32>
    %242 = arith.mulf %188, %241 : vector<16x16xf32>
    %243 = arith.addf %156, %240 : vector<16x16xf32>
    %244 = arith.addf %157, %242 : vector<16x16xf32>
    %c0_114 = arith.constant 0 : index
    %c3_115 = arith.constant 3 : index
    %c0_116 = arith.constant 0 : index
    %c0_117 = arith.constant 0 : index
    %c0_118 = arith.constant 0 : index
    %245 = vector.load %arg3[%c0_114, %c3_115, %c0_116, %c0_117, %c0_118] : memref<1x4x1x16x16xf32, #tpu.memory_space<vmem>>, vector<1x1x1x16x16xf32>
    %246 = vector.shape_cast %245 : vector<1x1x1x16x16xf32> to vector<16x16xf32>
    %cst_119 = arith.constant 0.000000e+00 : f32
    %247 = vector.broadcast %cst_119 : f32 to vector<16x16xf32>
    %248 = arith.cmpf oge, %246, %247 : vector<16x16xf32>
    %cst_120 = arith.constant 0.00999999977 : f32
    %249 = vector.broadcast %cst_120 : f32 to vector<16x16xf32>
    %250 = arith.mulf %249, %246 : vector<16x16xf32>
    %251 = arith.select %248, %246, %250 : vector<16x16xi1>, vector<16x16xf32>
    %cst_121 = arith.constant 7.500000e-01 : f32
    %252 = vector.broadcast %cst_121 : f32 to vector<16x16xf32>
    %253 = arith.mulf %252, %251 : vector<16x16xf32>
    %c0_122 = arith.constant 0 : index
    %c3_123 = arith.constant 3 : index
    %c0_124 = arith.constant 0 : index
    %c0_125 = arith.constant 0 : index
    %c0_126 = arith.constant 0 : index
    %254 = vector.load %arg2[%c0_122, %c3_123, %c0_124, %c0_125, %c0_126] : memref<1x4x1x16x16xf32, #tpu.memory_space<vmem>>, vector<1x1x1x16x16xf32>
    %255 = vector.shape_cast %254 : vector<1x1x1x16x16xf32> to vector<16x16xf32>
    %cst_127 = arith.constant 0.000000e+00 : f32
    %256 = vector.broadcast %cst_127 : f32 to vector<16x16xf32>
    %257 = arith.cmpf oge, %255, %256 : vector<16x16xf32>
    %cst_128 = arith.constant 0.00999999977 : f32
    %258 = vector.broadcast %cst_128 : f32 to vector<16x16xf32>
    %259 = arith.mulf %258, %255 : vector<16x16xf32>
    %260 = arith.select %257, %255, %259 : vector<16x16xi1>, vector<16x16xf32>
    %cst_129 = arith.constant 2.500000e-01 : f32
    %261 = vector.broadcast %cst_129 : f32 to vector<16x16xf32>
    %262 = arith.mulf %261, %260 : vector<16x16xf32>
    %263 = arith.addf %253, %262 : vector<16x16xf32>
    %cst_130 = arith.constant 7.500000e-01 : f32
    %264 = vector.broadcast %cst_130 : f32 to vector<16x16xf32>
    %265 = arith.mulf %264, %251 : vector<16x16xf32>
    %c0_131 = arith.constant 0 : index
    %c3_132 = arith.constant 3 : index
    %c0_133 = arith.constant 0 : index
    %c0_134 = arith.constant 0 : index
    %c0_135 = arith.constant 0 : index
    %266 = vector.load %arg4[%c0_131, %c3_132, %c0_133, %c0_134, %c0_135] : memref<1x4x1x16x16xf32, #tpu.memory_space<vmem>>, vector<1x1x1x16x16xf32>
    %267 = vector.shape_cast %266 : vector<1x1x1x16x16xf32> to vector<16x16xf32>
    %cst_136 = arith.constant 0.000000e+00 : f32
    %268 = vector.broadcast %cst_136 : f32 to vector<16x16xf32>
    %269 = arith.cmpf oge, %267, %268 : vector<16x16xf32>
    %cst_137 = arith.constant 0.00999999977 : f32
    %270 = vector.broadcast %cst_137 : f32 to vector<16x16xf32>
    %271 = arith.mulf %270, %267 : vector<16x16xf32>
    %272 = arith.select %269, %267, %271 : vector<16x16xi1>, vector<16x16xf32>
    %cst_138 = arith.constant 2.500000e-01 : f32
    %273 = vector.broadcast %cst_138 : f32 to vector<16x16xf32>
    %274 = arith.mulf %273, %272 : vector<16x16xf32>
    %275 = arith.addf %265, %274 : vector<16x16xf32>
    %c0_139 = arith.constant 0 : index
    %c3_140 = arith.constant 3 : index
    %276 = memref.load %arg7[%c0_139, %c3_140] : memref<8x4xf32, #tpu.memory_space<smem>>
    %277 = vector.broadcast %276 : f32 to vector<16x16xf32>
    %278 = arith.mulf %263, %277 : vector<16x16xf32>
    %279 = vector.broadcast %276 : f32 to vector<16x16xf32>
    %280 = arith.mulf %275, %279 : vector<16x16xf32>
    %281 = arith.addf %194, %278 : vector<16x16xf32>
    %282 = arith.addf %195, %280 : vector<16x16xf32>
    %c1_141 = arith.constant 1 : index
    %c3_142 = arith.constant 3 : index
    %283 = memref.load %arg7[%c1_141, %c3_142] : memref<8x4xf32, #tpu.memory_space<smem>>
    %284 = vector.broadcast %283 : f32 to vector<16x16xf32>
    %285 = arith.mulf %263, %284 : vector<16x16xf32>
    %286 = vector.broadcast %283 : f32 to vector<16x16xf32>
    %287 = arith.mulf %275, %286 : vector<16x16xf32>
    %288 = arith.addf %201, %285 : vector<16x16xf32>
    %289 = arith.addf %202, %287 : vector<16x16xf32>
    %c2_143 = arith.constant 2 : index
    %c3_144 = arith.constant 3 : index
    %290 = memref.load %arg7[%c2_143, %c3_144] : memref<8x4xf32, #tpu.memory_space<smem>>
    %291 = vector.broadcast %290 : f32 to vector<16x16xf32>
    %292 = arith.mulf %263, %291 : vector<16x16xf32>
    %293 = vector.broadcast %290 : f32 to vector<16x16xf32>
    %294 = arith.mulf %275, %293 : vector<16x16xf32>
    %295 = arith.addf %208, %292 : vector<16x16xf32>
    %296 = arith.addf %209, %294 : vector<16x16xf32>
    %c3_145 = arith.constant 3 : index
    %c3_146 = arith.constant 3 : index
    %297 = memref.load %arg7[%c3_145, %c3_146] : memref<8x4xf32, #tpu.memory_space<smem>>
    %298 = vector.broadcast %297 : f32 to vector<16x16xf32>
    %299 = arith.mulf %263, %298 : vector<16x16xf32>
    %300 = vector.broadcast %297 : f32 to vector<16x16xf32>
    %301 = arith.mulf %275, %300 : vector<16x16xf32>
    %302 = arith.addf %215, %299 : vector<16x16xf32>
    %303 = arith.addf %216, %301 : vector<16x16xf32>
    %c4_147 = arith.constant 4 : index
    %c3_148 = arith.constant 3 : index
    %304 = memref.load %arg7[%c4_147, %c3_148] : memref<8x4xf32, #tpu.memory_space<smem>>
    %305 = vector.broadcast %304 : f32 to vector<16x16xf32>
    %306 = arith.mulf %263, %305 : vector<16x16xf32>
    %307 = vector.broadcast %304 : f32 to vector<16x16xf32>
    %308 = arith.mulf %275, %307 : vector<16x16xf32>
    %309 = arith.addf %222, %306 : vector<16x16xf32>
    %310 = arith.addf %223, %308 : vector<16x16xf32>
    %c5_149 = arith.constant 5 : index
    %c3_150 = arith.constant 3 : index
    %311 = memref.load %arg7[%c5_149, %c3_150] : memref<8x4xf32, #tpu.memory_space<smem>>
    %312 = vector.broadcast %311 : f32 to vector<16x16xf32>
    %313 = arith.mulf %263, %312 : vector<16x16xf32>
    %314 = vector.broadcast %311 : f32 to vector<16x16xf32>
    %315 = arith.mulf %275, %314 : vector<16x16xf32>
    %316 = arith.addf %229, %313 : vector<16x16xf32>
    %317 = arith.addf %230, %315 : vector<16x16xf32>
    %c6_151 = arith.constant 6 : index
    %c3_152 = arith.constant 3 : index
    %318 = memref.load %arg7[%c6_151, %c3_152] : memref<8x4xf32, #tpu.memory_space<smem>>
    %319 = vector.broadcast %318 : f32 to vector<16x16xf32>
    %320 = arith.mulf %263, %319 : vector<16x16xf32>
    %321 = vector.broadcast %318 : f32 to vector<16x16xf32>
    %322 = arith.mulf %275, %321 : vector<16x16xf32>
    %323 = arith.addf %236, %320 : vector<16x16xf32>
    %324 = arith.addf %237, %322 : vector<16x16xf32>
    %c7_153 = arith.constant 7 : index
    %c3_154 = arith.constant 3 : index
    %325 = memref.load %arg7[%c7_153, %c3_154] : memref<8x4xf32, #tpu.memory_space<smem>>
    %326 = vector.broadcast %325 : f32 to vector<16x16xf32>
    %327 = arith.mulf %263, %326 : vector<16x16xf32>
    %328 = vector.broadcast %325 : f32 to vector<16x16xf32>
    %329 = arith.mulf %275, %328 : vector<16x16xf32>
    %330 = arith.addf %243, %327 : vector<16x16xf32>
    %331 = arith.addf %244, %329 : vector<16x16xf32>
    %c0_155 = arith.constant 0 : index
    %c0_156 = arith.constant 0 : index
    %332 = vector.load %arg5[%c0_155, %c0_156] : memref<32x16xf32, #tpu.memory_space<vmem>>, vector<32x16xf32>
    %c0_157 = arith.constant 0 : index
    %c0_158 = arith.constant 0 : index
    %333 = vector.load %arg6[%c0_157, %c0_158] : memref<16x32xf32, #tpu.memory_space<vmem>>, vector<16x32xf32>
    %c0_159 = arith.constant 0 : index
    %334 = memref.load %arg8[%c0_159] : memref<8xf32, #tpu.memory_space<smem>>
    %335 = vector.broadcast %334 : f32 to vector<16x16xf32>
    %336 = arith.addf %281, %335 : vector<16x16xf32>
    %337 = vector.broadcast %334 : f32 to vector<16x16xf32>
    %338 = arith.addf %282, %337 : vector<16x16xf32>
    %cst_160 = arith.constant dense<0.000000e+00> : vector<32x16xf32>
    %339 = tpu.matmul %332, %336, %cst_160 {dimension_numbers = #tpu.dot_dimension_numbers<[1], [0], [0], [1], [0, 0, 1, 1], [], []>} : vector<32x16xf32>, vector<16x16xf32>, vector<32x16xf32> -> vector<32x16xf32>
    %cst_161 = arith.constant dense<0.000000e+00> : vector<32x32xf32>
    %340 = tpu.matmul %339, %333, %cst_161 {dimension_numbers = #tpu.dot_dimension_numbers<[1], [0], [0], [1], [0, 0, 1, 1], [], []>} : vector<32x16xf32>, vector<16x32xf32>, vector<32x32xf32> -> vector<32x32xf32>
    %cst_162 = arith.constant dense<0.000000e+00> : vector<32x16xf32>
    %341 = tpu.matmul %332, %338, %cst_162 {dimension_numbers = #tpu.dot_dimension_numbers<[1], [0], [0], [1], [0, 0, 1, 1], [], []>} : vector<32x16xf32>, vector<16x16xf32>, vector<32x16xf32> -> vector<32x16xf32>
    %cst_163 = arith.constant dense<0.000000e+00> : vector<32x32xf32>
    %342 = tpu.matmul %341, %333, %cst_163 {dimension_numbers = #tpu.dot_dimension_numbers<[1], [0], [0], [1], [0, 0, 1, 1], [], []>} : vector<32x16xf32>, vector<16x32xf32>, vector<32x32xf32> -> vector<32x32xf32>
    %c0_164 = arith.constant 0 : index
    %c0_165 = arith.constant 0 : index
    %c0_166 = arith.constant 0 : index
    %c0_167 = arith.constant 0 : index
    %c0_168 = arith.constant 0 : index
    %343 = vector.load %arg9[%c0_164, %c0_165, %c0_166, %c0_167, %c0_168] : memref<1x8x2x32x32xf32, #tpu.memory_space<vmem>>, vector<1x1x1x32x32xf32>
    %344 = vector.shape_cast %343 : vector<1x1x1x32x32xf32> to vector<32x32xf32>
    %345 = vector.shape_cast %340 : vector<32x32xf32> to vector<1x1x1x32x32xf32>
    tpu.vector_store %arg9[%c0_164, %c0_165, %c0_166, %c0_167, %c0_168], %345 {strides = array<i32>} : memref<1x8x2x32x32xf32, #tpu.memory_space<vmem>>, vector<1x1x1x32x32xf32>,
    %c0_169 = arith.constant 0 : index
    %c0_170 = arith.constant 0 : index
    %c1_171 = arith.constant 1 : index
    %c0_172 = arith.constant 0 : index
    %c0_173 = arith.constant 0 : index
    %346 = vector.load %arg9[%c0_169, %c0_170, %c1_171, %c0_172, %c0_173] : memref<1x8x2x32x32xf32, #tpu.memory_space<vmem>>, vector<1x1x1x32x32xf32>
    %347 = vector.shape_cast %346 : vector<1x1x1x32x32xf32> to vector<32x32xf32>
    %348 = vector.shape_cast %342 : vector<32x32xf32> to vector<1x1x1x32x32xf32>
    tpu.vector_store %arg9[%c0_169, %c0_170, %c1_171, %c0_172, %c0_173], %348 {strides = array<i32>} : memref<1x8x2x32x32xf32, #tpu.memory_space<vmem>>, vector<1x1x1x32x32xf32>,
    %c1_174 = arith.constant 1 : index
    %349 = memref.load %arg8[%c1_174] : memref<8xf32, #tpu.memory_space<smem>>
    %350 = vector.broadcast %349 : f32 to vector<16x16xf32>
    %351 = arith.addf %288, %350 : vector<16x16xf32>
    %352 = vector.broadcast %349 : f32 to vector<16x16xf32>
    %353 = arith.addf %289, %352 : vector<16x16xf32>
    %cst_175 = arith.constant dense<0.000000e+00> : vector<32x16xf32>
    %354 = tpu.matmul %332, %351, %cst_175 {dimension_numbers = #tpu.dot_dimension_numbers<[1], [0], [0], [1], [0, 0, 1, 1], [], []>} : vector<32x16xf32>, vector<16x16xf32>, vector<32x16xf32> -> vector<32x16xf32>
    %cst_176 = arith.constant dense<0.000000e+00> : vector<32x32xf32>
    %355 = tpu.matmul %354, %333, %cst_176 {dimension_numbers = #tpu.dot_dimension_numbers<[1], [0], [0], [1], [0, 0, 1, 1], [], []>} : vector<32x16xf32>, vector<16x32xf32>, vector<32x32xf32> -> vector<32x32xf32>
    %cst_177 = arith.constant dense<0.000000e+00> : vector<32x16xf32>
    %356 = tpu.matmul %332, %353, %cst_177 {dimension_numbers = #tpu.dot_dimension_numbers<[1], [0], [0], [1], [0, 0, 1, 1], [], []>} : vector<32x16xf32>, vector<16x16xf32>, vector<32x16xf32> -> vector<32x16xf32>
    %cst_178 = arith.constant dense<0.000000e+00> : vector<32x32xf32>
    %357 = tpu.matmul %356, %333, %cst_178 {dimension_numbers = #tpu.dot_dimension_numbers<[1], [0], [0], [1], [0, 0, 1, 1], [], []>} : vector<32x16xf32>, vector<16x32xf32>, vector<32x32xf32> -> vector<32x32xf32>
    %c0_179 = arith.constant 0 : index
    %c1_180 = arith.constant 1 : index
    %c0_181 = arith.constant 0 : index
    %c0_182 = arith.constant 0 : index
    %c0_183 = arith.constant 0 : index
    %358 = vector.load %arg9[%c0_179, %c1_180, %c0_181, %c0_182, %c0_183] : memref<1x8x2x32x32xf32, #tpu.memory_space<vmem>>, vector<1x1x1x32x32xf32>
    %359 = vector.shape_cast %358 : vector<1x1x1x32x32xf32> to vector<32x32xf32>
    %360 = vector.shape_cast %355 : vector<32x32xf32> to vector<1x1x1x32x32xf32>
    tpu.vector_store %arg9[%c0_179, %c1_180, %c0_181, %c0_182, %c0_183], %360 {strides = array<i32>} : memref<1x8x2x32x32xf32, #tpu.memory_space<vmem>>, vector<1x1x1x32x32xf32>,
    %c0_184 = arith.constant 0 : index
    %c1_185 = arith.constant 1 : index
    %c1_186 = arith.constant 1 : index
    %c0_187 = arith.constant 0 : index
    %c0_188 = arith.constant 0 : index
    %361 = vector.load %arg9[%c0_184, %c1_185, %c1_186, %c0_187, %c0_188] : memref<1x8x2x32x32xf32, #tpu.memory_space<vmem>>, vector<1x1x1x32x32xf32>
    %362 = vector.shape_cast %361 : vector<1x1x1x32x32xf32> to vector<32x32xf32>
    %363 = vector.shape_cast %357 : vector<32x32xf32> to vector<1x1x1x32x32xf32>
    tpu.vector_store %arg9[%c0_184, %c1_185, %c1_186, %c0_187, %c0_188], %363 {strides = array<i32>} : memref<1x8x2x32x32xf32, #tpu.memory_space<vmem>>, vector<1x1x1x32x32xf32>,
    %c2_189 = arith.constant 2 : index
    %364 = memref.load %arg8[%c2_189] : memref<8xf32, #tpu.memory_space<smem>>
    %365 = vector.broadcast %364 : f32 to vector<16x16xf32>
    %366 = arith.addf %295, %365 : vector<16x16xf32>
    %367 = vector.broadcast %364 : f32 to vector<16x16xf32>
    %368 = arith.addf %296, %367 : vector<16x16xf32>
    %cst_190 = arith.constant dense<0.000000e+00> : vector<32x16xf32>
    %369 = tpu.matmul %332, %366, %cst_190 {dimension_numbers = #tpu.dot_dimension_numbers<[1], [0], [0], [1], [0, 0, 1, 1], [], []>} : vector<32x16xf32>, vector<16x16xf32>, vector<32x16xf32> -> vector<32x16xf32>
    %cst_191 = arith.constant dense<0.000000e+00> : vector<32x32xf32>
    %370 = tpu.matmul %369, %333, %cst_191 {dimension_numbers = #tpu.dot_dimension_numbers<[1], [0], [0], [1], [0, 0, 1, 1], [], []>} : vector<32x16xf32>, vector<16x32xf32>, vector<32x32xf32> -> vector<32x32xf32>
    %cst_192 = arith.constant dense<0.000000e+00> : vector<32x16xf32>
    %371 = tpu.matmul %332, %368, %cst_192 {dimension_numbers = #tpu.dot_dimension_numbers<[1], [0], [0], [1], [0, 0, 1, 1], [], []>} : vector<32x16xf32>, vector<16x16xf32>, vector<32x16xf32> -> vector<32x16xf32>
    %cst_193 = arith.constant dense<0.000000e+00> : vector<32x32xf32>
    %372 = tpu.matmul %371, %333, %cst_193 {dimension_numbers = #tpu.dot_dimension_numbers<[1], [0], [0], [1], [0, 0, 1, 1], [], []>} : vector<32x16xf32>, vector<16x32xf32>, vector<32x32xf32> -> vector<32x32xf32>
    %c0_194 = arith.constant 0 : index
    %c2_195 = arith.constant 2 : index
    %c0_196 = arith.constant 0 : index
    %c0_197 = arith.constant 0 : index
    %c0_198 = arith.constant 0 : index
    %373 = vector.load %arg9[%c0_194, %c2_195, %c0_196, %c0_197, %c0_198] : memref<1x8x2x32x32xf32, #tpu.memory_space<vmem>>, vector<1x1x1x32x32xf32>
    %374 = vector.shape_cast %373 : vector<1x1x1x32x32xf32> to vector<32x32xf32>
    %375 = vector.shape_cast %370 : vector<32x32xf32> to vector<1x1x1x32x32xf32>
    tpu.vector_store %arg9[%c0_194, %c2_195, %c0_196, %c0_197, %c0_198], %375 {strides = array<i32>} : memref<1x8x2x32x32xf32, #tpu.memory_space<vmem>>, vector<1x1x1x32x32xf32>,
    %c0_199 = arith.constant 0 : index
    %c2_200 = arith.constant 2 : index
    %c1_201 = arith.constant 1 : index
    %c0_202 = arith.constant 0 : index
    %c0_203 = arith.constant 0 : index
    %376 = vector.load %arg9[%c0_199, %c2_200, %c1_201, %c0_202, %c0_203] : memref<1x8x2x32x32xf32, #tpu.memory_space<vmem>>, vector<1x1x1x32x32xf32>
    %377 = vector.shape_cast %376 : vector<1x1x1x32x32xf32> to vector<32x32xf32>
    %378 = vector.shape_cast %372 : vector<32x32xf32> to vector<1x1x1x32x32xf32>
    tpu.vector_store %arg9[%c0_199, %c2_200, %c1_201, %c0_202, %c0_203], %378 {strides = array<i32>} : memref<1x8x2x32x32xf32, #tpu.memory_space<vmem>>, vector<1x1x1x32x32xf32>,
    %c3_204 = arith.constant 3 : index
    %379 = memref.load %arg8[%c3_204] : memref<8xf32, #tpu.memory_space<smem>>
    %380 = vector.broadcast %379 : f32 to vector<16x16xf32>
    %381 = arith.addf %302, %380 : vector<16x16xf32>
    %382 = vector.broadcast %379 : f32 to vector<16x16xf32>
    %383 = arith.addf %303, %382 : vector<16x16xf32>
    %cst_205 = arith.constant dense<0.000000e+00> : vector<32x16xf32>
    %384 = tpu.matmul %332, %381, %cst_205 {dimension_numbers = #tpu.dot_dimension_numbers<[1], [0], [0], [1], [0, 0, 1, 1], [], []>} : vector<32x16xf32>, vector<16x16xf32>, vector<32x16xf32> -> vector<32x16xf32>
    %cst_206 = arith.constant dense<0.000000e+00> : vector<32x32xf32>
    %385 = tpu.matmul %384, %333, %cst_206 {dimension_numbers = #tpu.dot_dimension_numbers<[1], [0], [0], [1], [0, 0, 1, 1], [], []>} : vector<32x16xf32>, vector<16x32xf32>, vector<32x32xf32> -> vector<32x32xf32>
    %cst_207 = arith.constant dense<0.000000e+00> : vector<32x16xf32>
    %386 = tpu.matmul %332, %383, %cst_207 {dimension_numbers = #tpu.dot_dimension_numbers<[1], [0], [0], [1], [0, 0, 1, 1], [], []>} : vector<32x16xf32>, vector<16x16xf32>, vector<32x16xf32> -> vector<32x16xf32>
    %cst_208 = arith.constant dense<0.000000e+00> : vector<32x32xf32>
    %387 = tpu.matmul %386, %333, %cst_208 {dimension_numbers = #tpu.dot_dimension_numbers<[1], [0], [0], [1], [0, 0, 1, 1], [], []>} : vector<32x16xf32>, vector<16x32xf32>, vector<32x32xf32> -> vector<32x32xf32>
    %c0_209 = arith.constant 0 : index
    %c3_210 = arith.constant 3 : index
    %c0_211 = arith.constant 0 : index
    %c0_212 = arith.constant 0 : index
    %c0_213 = arith.constant 0 : index
    %388 = vector.load %arg9[%c0_209, %c3_210, %c0_211, %c0_212, %c0_213] : memref<1x8x2x32x32xf32, #tpu.memory_space<vmem>>, vector<1x1x1x32x32xf32>
    %389 = vector.shape_cast %388 : vector<1x1x1x32x32xf32> to vector<32x32xf32>
    %390 = vector.shape_cast %385 : vector<32x32xf32> to vector<1x1x1x32x32xf32>
    tpu.vector_store %arg9[%c0_209, %c3_210, %c0_211, %c0_212, %c0_213], %390 {strides = array<i32>} : memref<1x8x2x32x32xf32, #tpu.memory_space<vmem>>, vector<1x1x1x32x32xf32>,
    %c0_214 = arith.constant 0 : index
    %c3_215 = arith.constant 3 : index
    %c1_216 = arith.constant 1 : index
    %c0_217 = arith.constant 0 : index
    %c0_218 = arith.constant 0 : index
    %391 = vector.load %arg9[%c0_214, %c3_215, %c1_216, %c0_217, %c0_218] : memref<1x8x2x32x32xf32, #tpu.memory_space<vmem>>, vector<1x1x1x32x32xf32>
    %392 = vector.shape_cast %391 : vector<1x1x1x32x32xf32> to vector<32x32xf32>
    %393 = vector.shape_cast %387 : vector<32x32xf32> to vector<1x1x1x32x32xf32>
    tpu.vector_store %arg9[%c0_214, %c3_215, %c1_216, %c0_217, %c0_218], %393 {strides = array<i32>} : memref<1x8x2x32x32xf32, #tpu.memory_space<vmem>>, vector<1x1x1x32x32xf32>,
    %c4_219 = arith.constant 4 : index
    %394 = memref.load %arg8[%c4_219] : memref<8xf32, #tpu.memory_space<smem>>
    %395 = vector.broadcast %394 : f32 to vector<16x16xf32>
    %396 = arith.addf %309, %395 : vector<16x16xf32>
    %397 = vector.broadcast %394 : f32 to vector<16x16xf32>
    %398 = arith.addf %310, %397 : vector<16x16xf32>
    %cst_220 = arith.constant dense<0.000000e+00> : vector<32x16xf32>
    %399 = tpu.matmul %332, %396, %cst_220 {dimension_numbers = #tpu.dot_dimension_numbers<[1], [0], [0], [1], [0, 0, 1, 1], [], []>} : vector<32x16xf32>, vector<16x16xf32>, vector<32x16xf32> -> vector<32x16xf32>
    %cst_221 = arith.constant dense<0.000000e+00> : vector<32x32xf32>
    %400 = tpu.matmul %399, %333, %cst_221 {dimension_numbers = #tpu.dot_dimension_numbers<[1], [0], [0], [1], [0, 0, 1, 1], [], []>} : vector<32x16xf32>, vector<16x32xf32>, vector<32x32xf32> -> vector<32x32xf32>
    %cst_222 = arith.constant dense<0.000000e+00> : vector<32x16xf32>
    %401 = tpu.matmul %332, %398, %cst_222 {dimension_numbers = #tpu.dot_dimension_numbers<[1], [0], [0], [1], [0, 0, 1, 1], [], []>} : vector<32x16xf32>, vector<16x16xf32>, vector<32x16xf32> -> vector<32x16xf32>
    %cst_223 = arith.constant dense<0.000000e+00> : vector<32x32xf32>
    %402 = tpu.matmul %401, %333, %cst_223 {dimension_numbers = #tpu.dot_dimension_numbers<[1], [0], [0], [1], [0, 0, 1, 1], [], []>} : vector<32x16xf32>, vector<16x32xf32>, vector<32x32xf32> -> vector<32x32xf32>
    %c0_224 = arith.constant 0 : index
    %c4_225 = arith.constant 4 : index
    %c0_226 = arith.constant 0 : index
    %c0_227 = arith.constant 0 : index
    %c0_228 = arith.constant 0 : index
    %403 = vector.load %arg9[%c0_224, %c4_225, %c0_226, %c0_227, %c0_228] : memref<1x8x2x32x32xf32, #tpu.memory_space<vmem>>, vector<1x1x1x32x32xf32>
    %404 = vector.shape_cast %403 : vector<1x1x1x32x32xf32> to vector<32x32xf32>
    %405 = vector.shape_cast %400 : vector<32x32xf32> to vector<1x1x1x32x32xf32>
    tpu.vector_store %arg9[%c0_224, %c4_225, %c0_226, %c0_227, %c0_228], %405 {strides = array<i32>} : memref<1x8x2x32x32xf32, #tpu.memory_space<vmem>>, vector<1x1x1x32x32xf32>,
    %c0_229 = arith.constant 0 : index
    %c4_230 = arith.constant 4 : index
    %c1_231 = arith.constant 1 : index
    %c0_232 = arith.constant 0 : index
    %c0_233 = arith.constant 0 : index
    %406 = vector.load %arg9[%c0_229, %c4_230, %c1_231, %c0_232, %c0_233] : memref<1x8x2x32x32xf32, #tpu.memory_space<vmem>>, vector<1x1x1x32x32xf32>
    %407 = vector.shape_cast %406 : vector<1x1x1x32x32xf32> to vector<32x32xf32>
    %408 = vector.shape_cast %402 : vector<32x32xf32> to vector<1x1x1x32x32xf32>
    tpu.vector_store %arg9[%c0_229, %c4_230, %c1_231, %c0_232, %c0_233], %408 {strides = array<i32>} : memref<1x8x2x32x32xf32, #tpu.memory_space<vmem>>, vector<1x1x1x32x32xf32>,
    %c5_234 = arith.constant 5 : index
    %409 = memref.load %arg8[%c5_234] : memref<8xf32, #tpu.memory_space<smem>>
    %410 = vector.broadcast %409 : f32 to vector<16x16xf32>
    %411 = arith.addf %316, %410 : vector<16x16xf32>
    %412 = vector.broadcast %409 : f32 to vector<16x16xf32>
    %413 = arith.addf %317, %412 : vector<16x16xf32>
    %cst_235 = arith.constant dense<0.000000e+00> : vector<32x16xf32>
    %414 = tpu.matmul %332, %411, %cst_235 {dimension_numbers = #tpu.dot_dimension_numbers<[1], [0], [0], [1], [0, 0, 1, 1], [], []>} : vector<32x16xf32>, vector<16x16xf32>, vector<32x16xf32> -> vector<32x16xf32>
    %cst_236 = arith.constant dense<0.000000e+00> : vector<32x32xf32>
    %415 = tpu.matmul %414, %333, %cst_236 {dimension_numbers = #tpu.dot_dimension_numbers<[1], [0], [0], [1], [0, 0, 1, 1], [], []>} : vector<32x16xf32>, vector<16x32xf32>, vector<32x32xf32> -> vector<32x32xf32>
    %cst_237 = arith.constant dense<0.000000e+00> : vector<32x16xf32>
    %416 = tpu.matmul %332, %413, %cst_237 {dimension_numbers = #tpu.dot_dimension_numbers<[1], [0], [0], [1], [0, 0, 1, 1], [], []>} : vector<32x16xf32>, vector<16x16xf32>, vector<32x16xf32> -> vector<32x16xf32>
    %cst_238 = arith.constant dense<0.000000e+00> : vector<32x32xf32>
    %417 = tpu.matmul %416, %333, %cst_238 {dimension_numbers = #tpu.dot_dimension_numbers<[1], [0], [0], [1], [0, 0, 1, 1], [], []>} : vector<32x16xf32>, vector<16x32xf32>, vector<32x32xf32> -> vector<32x32xf32>
    %c0_239 = arith.constant 0 : index
    %c5_240 = arith.constant 5 : index
    %c0_241 = arith.constant 0 : index
    %c0_242 = arith.constant 0 : index
    %c0_243 = arith.constant 0 : index
    %418 = vector.load %arg9[%c0_239, %c5_240, %c0_241, %c0_242, %c0_243] : memref<1x8x2x32x32xf32, #tpu.memory_space<vmem>>, vector<1x1x1x32x32xf32>
    %419 = vector.shape_cast %418 : vector<1x1x1x32x32xf32> to vector<32x32xf32>
    %420 = vector.shape_cast %415 : vector<32x32xf32> to vector<1x1x1x32x32xf32>
    tpu.vector_store %arg9[%c0_239, %c5_240, %c0_241, %c0_242, %c0_243], %420 {strides = array<i32>} : memref<1x8x2x32x32xf32, #tpu.memory_space<vmem>>, vector<1x1x1x32x32xf32>,
    %c0_244 = arith.constant 0 : index
    %c5_245 = arith.constant 5 : index
    %c1_246 = arith.constant 1 : index
    %c0_247 = arith.constant 0 : index
    %c0_248 = arith.constant 0 : index
    %421 = vector.load %arg9[%c0_244, %c5_245, %c1_246, %c0_247, %c0_248] : memref<1x8x2x32x32xf32, #tpu.memory_space<vmem>>, vector<1x1x1x32x32xf32>
    %422 = vector.shape_cast %421 : vector<1x1x1x32x32xf32> to vector<32x32xf32>
    %423 = vector.shape_cast %417 : vector<32x32xf32> to vector<1x1x1x32x32xf32>
    tpu.vector_store %arg9[%c0_244, %c5_245, %c1_246, %c0_247, %c0_248], %423 {strides = array<i32>} : memref<1x8x2x32x32xf32, #tpu.memory_space<vmem>>, vector<1x1x1x32x32xf32>,
    %c6_249 = arith.constant 6 : index
    %424 = memref.load %arg8[%c6_249] : memref<8xf32, #tpu.memory_space<smem>>
    %425 = vector.broadcast %424 : f32 to vector<16x16xf32>
    %426 = arith.addf %323, %425 : vector<16x16xf32>
    %427 = vector.broadcast %424 : f32 to vector<16x16xf32>
    %428 = arith.addf %324, %427 : vector<16x16xf32>
    %cst_250 = arith.constant dense<0.000000e+00> : vector<32x16xf32>
    %429 = tpu.matmul %332, %426, %cst_250 {dimension_numbers = #tpu.dot_dimension_numbers<[1], [0], [0], [1], [0, 0, 1, 1], [], []>} : vector<32x16xf32>, vector<16x16xf32>, vector<32x16xf32> -> vector<32x16xf32>
    %cst_251 = arith.constant dense<0.000000e+00> : vector<32x32xf32>
    %430 = tpu.matmul %429, %333, %cst_251 {dimension_numbers = #tpu.dot_dimension_numbers<[1], [0], [0], [1], [0, 0, 1, 1], [], []>} : vector<32x16xf32>, vector<16x32xf32>, vector<32x32xf32> -> vector<32x32xf32>
    %cst_252 = arith.constant dense<0.000000e+00> : vector<32x16xf32>
    %431 = tpu.matmul %332, %428, %cst_252 {dimension_numbers = #tpu.dot_dimension_numbers<[1], [0], [0], [1], [0, 0, 1, 1], [], []>} : vector<32x16xf32>, vector<16x16xf32>, vector<32x16xf32> -> vector<32x16xf32>
    %cst_253 = arith.constant dense<0.000000e+00> : vector<32x32xf32>
    %432 = tpu.matmul %431, %333, %cst_253 {dimension_numbers = #tpu.dot_dimension_numbers<[1], [0], [0], [1], [0, 0, 1, 1], [], []>} : vector<32x16xf32>, vector<16x32xf32>, vector<32x32xf32> -> vector<32x32xf32>
    %c0_254 = arith.constant 0 : index
    %c6_255 = arith.constant 6 : index
    %c0_256 = arith.constant 0 : index
    %c0_257 = arith.constant 0 : index
    %c0_258 = arith.constant 0 : index
    %433 = vector.load %arg9[%c0_254, %c6_255, %c0_256, %c0_257, %c0_258] : memref<1x8x2x32x32xf32, #tpu.memory_space<vmem>>, vector<1x1x1x32x32xf32>
    %434 = vector.shape_cast %433 : vector<1x1x1x32x32xf32> to vector<32x32xf32>
    %435 = vector.shape_cast %430 : vector<32x32xf32> to vector<1x1x1x32x32xf32>
    tpu.vector_store %arg9[%c0_254, %c6_255, %c0_256, %c0_257, %c0_258], %435 {strides = array<i32>} : memref<1x8x2x32x32xf32, #tpu.memory_space<vmem>>, vector<1x1x1x32x32xf32>,
    %c0_259 = arith.constant 0 : index
    %c6_260 = arith.constant 6 : index
    %c1_261 = arith.constant 1 : index
    %c0_262 = arith.constant 0 : index
    %c0_263 = arith.constant 0 : index
    %436 = vector.load %arg9[%c0_259, %c6_260, %c1_261, %c0_262, %c0_263] : memref<1x8x2x32x32xf32, #tpu.memory_space<vmem>>, vector<1x1x1x32x32xf32>
    %437 = vector.shape_cast %436 : vector<1x1x1x32x32xf32> to vector<32x32xf32>
    %438 = vector.shape_cast %432 : vector<32x32xf32> to vector<1x1x1x32x32xf32>
    tpu.vector_store %arg9[%c0_259, %c6_260, %c1_261, %c0_262, %c0_263], %438 {strides = array<i32>} : memref<1x8x2x32x32xf32, #tpu.memory_space<vmem>>, vector<1x1x1x32x32xf32>,
    %c7_264 = arith.constant 7 : index
    %439 = memref.load %arg8[%c7_264] : memref<8xf32, #tpu.memory_space<smem>>
    %440 = vector.broadcast %439 : f32 to vector<16x16xf32>
    %441 = arith.addf %330, %440 : vector<16x16xf32>
    %442 = vector.broadcast %439 : f32 to vector<16x16xf32>
    %443 = arith.addf %331, %442 : vector<16x16xf32>
    %cst_265 = arith.constant dense<0.000000e+00> : vector<32x16xf32>
    %444 = tpu.matmul %332, %441, %cst_265 {dimension_numbers = #tpu.dot_dimension_numbers<[1], [0], [0], [1], [0, 0, 1, 1], [], []>} : vector<32x16xf32>, vector<16x16xf32>, vector<32x16xf32> -> vector<32x16xf32>
    %cst_266 = arith.constant dense<0.000000e+00> : vector<32x32xf32>
    %445 = tpu.matmul %444, %333, %cst_266 {dimension_numbers = #tpu.dot_dimension_numbers<[1], [0], [0], [1], [0, 0, 1, 1], [], []>} : vector<32x16xf32>, vector<16x32xf32>, vector<32x32xf32> -> vector<32x32xf32>
    %cst_267 = arith.constant dense<0.000000e+00> : vector<32x16xf32>
    %446 = tpu.matmul %332, %443, %cst_267 {dimension_numbers = #tpu.dot_dimension_numbers<[1], [0], [0], [1], [0, 0, 1, 1], [], []>} : vector<32x16xf32>, vector<16x16xf32>, vector<32x16xf32> -> vector<32x16xf32>
    %cst_268 = arith.constant dense<0.000000e+00> : vector<32x32xf32>
    %447 = tpu.matmul %446, %333, %cst_268 {dimension_numbers = #tpu.dot_dimension_numbers<[1], [0], [0], [1], [0, 0, 1, 1], [], []>} : vector<32x16xf32>, vector<16x32xf32>, vector<32x32xf32> -> vector<32x32xf32>
    %c0_269 = arith.constant 0 : index
    %c7_270 = arith.constant 7 : index
    %c0_271 = arith.constant 0 : index
    %c0_272 = arith.constant 0 : index
    %c0_273 = arith.constant 0 : index
    %448 = vector.load %arg9[%c0_269, %c7_270, %c0_271, %c0_272, %c0_273] : memref<1x8x2x32x32xf32, #tpu.memory_space<vmem>>, vector<1x1x1x32x32xf32>
    %449 = vector.shape_cast %448 : vector<1x1x1x32x32xf32> to vector<32x32xf32>
    %450 = vector.shape_cast %445 : vector<32x32xf32> to vector<1x1x1x32x32xf32>
    tpu.vector_store %arg9[%c0_269, %c7_270, %c0_271, %c0_272, %c0_273], %450 {strides = array<i32>} : memref<1x8x2x32x32xf32, #tpu.memory_space<vmem>>, vector<1x1x1x32x32xf32>,
    %c0_274 = arith.constant 0 : index
    %c7_275 = arith.constant 7 : index
    %c1_276 = arith.constant 1 : index
    %c0_277 = arith.constant 0 : index
    %c0_278 = arith.constant 0 : index
    %451 = vector.load %arg9[%c0_274, %c7_275, %c1_276, %c0_277, %c0_278] : memref<1x8x2x32x32xf32, #tpu.memory_space<vmem>>, vector<1x1x1x32x32xf32>
    %452 = vector.shape_cast %451 : vector<1x1x1x32x32xf32> to vector<32x32xf32>
    %453 = vector.shape_cast %447 : vector<32x32xf32> to vector<1x1x1x32x32xf32>
    tpu.vector_store %arg9[%c0_274, %c7_275, %c1_276, %c0_277, %c0_278], %453 {strides = array<i32>} : memref<1x8x2x32x32xf32, #tpu.memory_space<vmem>>, vector<1x1x1x32x32xf32>,
    return
  }
  func.func @transform_0(%arg0: i32, %arg1: i32) -> (i32, i32, i32, i32, i32) {
    %c1_i32 = arith.constant 1 : i32
    %0 = arith.subi %arg1, %c1_i32 : i32
    %c0_i32 = arith.constant 0 : i32
    %1 = arith.maxsi %0, %c0_i32 : i32
    %c0_i32_0 = arith.constant 0 : i32
    %c0_i32_1 = arith.constant 0 : i32
    %c0_i32_2 = arith.constant 0 : i32
    %c0_i32_3 = arith.constant 0 : i32
    return %arg0, %c0_i32_0, %1, %c0_i32_1, %c0_i32_2 : i32, i32, i32, i32, i32
  }
  func.func @transform_1(%arg0: i32, %arg1: i32) -> (i32, i32, i32, i32, i32) {
    %c0_i32 = arith.constant 0 : i32
    %c0_i32_0 = arith.constant 0 : i32
    %c0_i32_1 = arith.constant 0 : i32
    %c0_i32_2 = arith.constant 0 : i32
    return %arg0, %c0_i32, %arg1, %c0_i32_0, %c0_i32_1 : i32, i32, i32, i32, i32
  }
  func.func @transform_2(%arg0: i32, %arg1: i32) -> (i32, i32, i32, i32, i32) {
    %c1_i32 = arith.constant 1 : i32
    %0 = arith.addi %arg1, %c1_i32 : i32
    %c7_i32 = arith.constant 7 : i32
    %1 = arith.minsi %0, %c7_i32 : i32
    %c0_i32 = arith.constant 0 : i32
    %c0_i32_0 = arith.constant 0 : i32
    %c0_i32_1 = arith.constant 0 : i32
    %c0_i32_2 = arith.constant 0 : i32
    return %arg0, %c0_i32, %1, %c0_i32_0, %c0_i32_1 : i32, i32, i32, i32, i32
  }
  func.func @transform_3(%arg0: i32, %arg1: i32) -> (i32, i32) {
    %c0_i32 = arith.constant 0 : i32
    %c0_i32_0 = arith.constant 0 : i32
    %c0_i32_1 = arith.constant 0 : i32
    return %c0_i32, %c0_i32_0 : i32, i32
  }
  func.func @transform_4(%arg0: i32, %arg1: i32) -> (i32, i32) {
    %c0_i32 = arith.constant 0 : i32
    %c0_i32_0 = arith.constant 0 : i32
    %c0_i32_1 = arith.constant 0 : i32
    return %c0_i32, %c0_i32_0 : i32, i32
  }
  func.func @transform_5(%arg0: i32, %arg1: i32) -> (i32, i32) {
    %c0_i32 = arith.constant 0 : i32
    %c0_i32_0 = arith.constant 0 : i32
    %c0_i32_1 = arith.constant 0 : i32
    return %c0_i32, %c0_i32_0 : i32, i32
  }
  func.func @transform_6(%arg0: i32, %arg1: i32) -> i32 {
    %c0_i32 = arith.constant 0 : i32
    %c0_i32_0 = arith.constant 0 : i32
    return %c0_i32 : i32
  }
  func.func @transform_7(%arg0: i32, %arg1: i32) -> (i32, i32, i32, i32, i32) {
    %c0_i32 = arith.constant 0 : i32
    %c0_i32_0 = arith.constant 0 : i32
    %c0_i32_1 = arith.constant 0 : i32
    %c0_i32_2 = arith.constant 0 : i32
    return %arg0, %c0_i32, %arg1, %c0_i32_0, %c0_i32_1 : i32, i32, i32, i32, i32
  }
}

</mosaic_0001>

<bundles_post_ra>
// kernel: vuconv_forward.1
= control target key start
LH: loop header
LB: loop body
LE: loop exit
PB: predicated region body
PF: predicated region fallthrough
CT: control target
= control target key end

     0   :  { %s4447_s0 = inlined_call_operand.hbm [shape: f32[2,4,8,16,16], index: 0, kind: input, shape index: {}, may-alias: {0,1,2}]   ;;  %s4448_s1 = inlined_call_operand.hbm [shape: f32[2,4,8,16,16], index: 1, kind: input, shape index: {}, may-alias: {0,1,2}]   ;;  %s4449_s2 = inlined_call_operand.hbm [shape: f32[2,4,8,16,16], index: 2, kind: input, shape index: {}, may-alias: {0,1,2}]   ;;  %s4450_s3 = inlined_call_operand.hbm [shape: f32[32,16], index: 3, kind: input, shape index: {}]   ;;  %s4451_s4 = inlined_call_operand.hbm [shape: f32[16,32], index: 4, kind: input, shape index: {}]   ;;  %s4452_s5 = inlined_call_operand.vmem [shape: f32[8,4], index: 5, kind: input, shape index: {}]   ;;  %s4453_s6 = inlined_call_operand.hbm [shape: f32[8], index: 6, kind: input, shape index: {}]   ;;  %s4454_s7 = inlined_call_operand.hbm [shape: f32[2,8,16,32,32], index: 7, kind: output, shape index: {}]  }
   0x1   :  { %4477 = sst [smem:[#allocation52_spill]] %s4449_s2 }
   0x2   :  { %4478 = sst [smem:[#allocation53_spill]] %s4450_s3 }
   0x3   :  { %4479 = sst [smem:[#allocation54_spill]] %s4451_s4 }
   0x4   :  { %4480 = sst [smem:[#allocation55_spill]] %s4454_s7 }
   0x5   :  { %12 = vsyncpa [#allocation3], 0 }
   0x6   :  { %14 = vsyncpa [#allocation3 + $0x1], 0 }
   0x7   :  { %15 = vsyncpa [#allocation8], 0 }
   0x8   :  { %17 = vsyncpa [#allocation8 + $0x1], 0 }
   0x9   :  { %18 = vsyncpa [#allocation11], 0 }
   0xa   :  { %19 = vsyncpa [#allocation6], 0 }
   0xb   :  { %20 = vsyncpa [#allocation5], 0 }
   0xc   :  { %21 = vsyncpa [#allocation4], 0 }
   0xd   :  { %23 = vsyncpa [#allocation4 + $0x1], 0  ;;  %s3299_s24 = smov 0   ;;  %s3301_s25 = smov 0  }
   0xe   :  { %s3303_s26 = smov 0   ;;  %s3305_s27 = smov 0  }
   0xf   :  { %s3307_s28 = smov 0   ;;  %s3309_s29 = smov 0  }
  0x10   :  { %s3311_s30 = smov 0   ;;  %s3313_s8 = smov 0  }
  0x11   :  { %s3315_s9 = smov 0   ;;  %s3317_s10 = smov 0  }
  0x12   :  { %s3319_s11 = smov 0   ;;  %s3321_s12 = smov 0  }
  0x13   :  { %s3323_s13 = smov 0   ;;  %s3325_s14 = smov 0  }
  0x14 LB: > { %4481 = sst [smem:[#allocation34_spill]] %s3179_s25  ;;  %s3370_s15 = sadd.s32 4294967295, %s3227_s14   ;;  %s3227_s14 = sphi %s3325_s14, %s29_s14   ;;  %s3223_s13 = sphi %s3323_s13, %s4556_s13   ;;  %s3219_s12 = sphi %s3321_s12, %s4555_s12   ;;  %s3215_s11 = sphi %s3319_s11, %s4554_s11   ;;  %s3211_s10 = sphi %s3317_s10, %s4553_s10   ;;  %s3207_s9 = sphi %s3315_s9, %s4552_s9   ;;  %s3203_s8 = sphi %s3313_s8, %s4551_s8   ;;  %s3199_s30 = sphi %s3311_s30, %s4542_s30   ;;  %s3195_s29 = sphi %s3309_s29, %s4550_s29   ;;  %s3191_s28 = sphi %s3307_s28, %s4549_s28   ;;  %s3187_s27 = sphi %s3305_s27, %s4548_s27   ;;  %s3183_s26 = sphi %s3303_s26, %s4547_s26   ;;  %s3179_s25 = sphi %s3301_s25, %s4546_s25   ;;  %s3175_s24 = sphi %s3299_s24, %s4538_s24  }
  0x15   : > { %4482 = sst [smem:[#allocation35_spill]] %s3187_s27  ;;  %s3374_s17 = sadd.s32 1, %s3219_s12 }
  0x16   : > { %4483 = sst [smem:[#allocation36_spill]] %s3191_s28  ;;  %s41_s18 = sadd.s32 1, %s3223_s13 }
  0x17   : > { %4484 = sst [smem:[#allocation37_spill]] %s3203_s8  ;;  %p39_p0 = scmp.ge.s32.totalorder %s3374_s17, 8 }
  0x18   : > { %4485 = sst [smem:[#allocation38_spill]] %s3211_s10  ;;  %s2492_s19 = sadd.s32 4294967295, %s3219_s12 }
  0x19   : > { %4486 = sst [smem:[#allocation39_spill]] %s3215_s11  ;;  %p46_p1 = scmp.gt.s32.totalorder %s2492_s19, 0 }
  0x1a   : > { %4487 = sst [smem:[#allocation40_spill]] %s3370_s15  ;;  %s56_s20 = sadd.s32 1, %s3207_s9 }
  0x1b   : > { %s3381_s21 = scalar_select %p39_p0, 0, %s3374_s17  }
  0x1c   : > { %s4558_s18 = smov (!%p39_p0, %s41_s18), %s3223_s13  ;;  %s4560_s19 = smov (!%p46_p1, %s2492_s19), 0 }
  0x1d   : > { %4488 = sst [smem:[#allocation41_spill]] %s3381_s21  ;;  %p43_p2 = scmp.ge.s32.totalorder %s4558_s18, 2 }
  0x1e   : > { %s2493_s22 = sadd.s32 4294967295, %s3381_s21  ;;  %p63_p4 = scmp.ne.s32.totalorder %s3207_s9, %s3203_s8 }
  0x1f   : > { %p49_p3 = scmp.gt.s32.totalorder %s2493_s22, 0  ;;  %s4562_s18 = smov (%p43_p2, %s4558_s18), 0 }
  0x20   : > { %4489 = sst [smem:[#allocation42_spill]] %s4562_s18  ;;  %s3393_s23 = ssub.s32 %s3223_s13, %s4562_s18 }
  0x21   : > { %s4564_s22 = smov (!%p49_p3, %s2493_s22), 0  ;;  %p64_p5 = scmp.eq.s32.totalorder %s3227_s14, 0 }
  0x22   : > { %s52_s16 = ssub.s32 %s4560_s19, %s4564_s22  ;;  %p69_p6 = scmp.ne.s32.totalorder %s3203_s8, %s3199_s30 }
  0x23   : > { %s53_s7 = sor.u32 %s52_s16, %s3393_s23  ;;  %p3402_p7 = por %p64_p5, %p63_p4 }
  0x24   : > { %p54_p8 = scmp.eq.s32.totalorder %s53_s7, 0  ;;  %p4466_p9 = scmp.eq.s32.totalorder %s3370_s15, 0 }
  0x25   : > { %s80_s18 = ssub.s32 %s3219_s12, %s3381_s21  ;;  %s84_s22 = sadd.s32 1, %s3195_s29 }
  0x26   : > { %s3411_s30 = scalar_select %p54_p8, %s3207_s9, %s56_s20  }
  0x27   : > { %p3415_p10 = por %p4466_p9, %p69_p6  ;;  %s81_s10 = sor.u32 %s80_s18, %s3393_s23 }
  0x28   : > { %4491 = sst [smem:[#allocation43_spill]] %s3411_s30  ;;  %p82_p11 = scmp.eq.s32.totalorder %s81_s10, 0 }
  0x29   : > { %s4492_s16 = scalar_select %p3415_p10, 1, 0 }
  0x2a   : > { %p91_p12 = scmp.ne.s32.totalorder %s3195_s29, %s3191_s28  ;;  %p4458_p13 = scmp.ne.s32.totalorder %s3191_s28, %s3187_s27 }
  0x2b   : > { %4493 = sst [smem:[#allocation44_spill]] %s4492_s16  ;;  %p108_p0 = scmp.lt.s32.totalorder %s3374_s17, 7 }
  0x2c   : > { %s3426_s7 = scalar_select %p82_p11, %s3195_s29, %s84_s22  }
  0x2d   : > { %p3433_p1 = por %p91_p12, %p64_p5  ;;  %p3442_p2 = por %p4458_p13, %p4466_p9 }
  0x2e   : > { %4494 = sst [smem:[#allocation45_spill]] %s3426_s7  ;;  %s4566_s17 = smov (!%p108_p0, %s3374_s17), 7 }
  0x2f   : > { %s4496_s10 = scalar_select %p3442_p2, 1, 0 }
  0x30   : > { %s110_s18 = sadd.s32 1, %s3381_s21  ;;  %s118_s22 = sadd.s32 1, %s3183_s26 }
  0x31   : > { %4497 = sst [smem:[#allocation46_spill]] %s4496_s10  ;;  %p111_p3 = scmp.lt.s32.totalorder %s110_s18, 7 }
  0x32   : > { %p125_p4 = scmp.ne.s32.totalorder %s3183_s26, %s3179_s25  ;;  %p131_p6 = scmp.ne.s32.totalorder %s3179_s25, %s3175_s24 }
  0x33   : > { %p241_p8 = scmp.eq.s32.totalorder %s3370_s15, 15  ;;  %s4568_s18 = smov (!%p111_p3, %s110_s18), 7 }
  0x34   : > { %p3458_p11 = por %p125_p4, %p64_p5  ;;  %p3464_p0 = por %p131_p6, %p4466_p9 }
  0x35   : > { %s114_s10 = ssub.s32 %s4566_s17, %s4568_s18  ;;  %p3472_p13 = por %p241_p8, %p91_p12 }
  0x36   : > { %s4499_s7 = scalar_select %p3464_p0, 1, 0 }
  0x37   : > { %s4501_s21 = scalar_select %p3472_p13, 1, 0 }
  0x38   : > { %4500 = sst [smem:[#allocation47_spill]] %s4499_s7  ;;  %s115_s24 = sor.u32 %s114_s10, %s3393_s23 }
  0x39   : > { %4502 = sst [smem:[#allocation48_spill]] %s4501_s21  ;;  %s4503_s25 = sadd.s32 4294967294, %s3227_s14  }
  0x3a   : > { %p247_p3 = scmp.eq.s32.totalorder %s4503_s25, 15  ;;  %p116_p2 = scmp.eq.s32.totalorder %s115_s24, 0 }
  0x3b   : > { %p2494_p5 = scmp.ge.s32.totalorder %s3227_s14, 1  ;;  %p4504_p4 = scmp.ne.s32.totalorder %s3191_s28, %s3187_s27 }
  0x3c   : > { %p254_p6 = scmp.lt.s32.totalorder %s3227_s14, 17  ;;  %s4510_s3 = sld [smem:[#allocation53_spill]] }
  0x3d   : > { %p3483_p10 = por %p247_p3, %p4504_p4  ;;  %s3229_s25 = smov [#allocation10]  }
  0x3e   : > { %s3489_s8 = scalar_select %p116_p2, %s3183_s26, %s118_s22  }
  0x3f   : > { %s4505_s16 = scalar_select %p3483_p10, 1, 0 }
  0x40   : > { %4507 = sst [smem:[#allocation50_spill]] %s3489_s8  ;;  %p3491_p9 = pnand %p2494_p5, %p254_p6 }
  0x41   : > { %4506 = sst [smem:[#allocation49_spill]] %s4505_s16  ;;  %s267_s10 = sshll.u32 %s3229_s25, 4  ;;  %s268_s10 = int_to_ptr.vmem [resolvable:$true] %s267_s10 }
  0x42   : > { %s4508_s18 = scalar_select %p3491_p9, 1, 0 }
  0x43   : > { %s265_s23 = sshll.u32 %s4510_s3, 4  ;;  %p2831_p12 = pneg %p3491_p9  ;;  %s266_s23 = int_to_ptr.hbm [resolvable:$true] %s265_s23 }
  0x44   : > { %4509 = sst [smem:[#allocation51_spill]] %s4508_s18  ;;  %p4511_p8 = scmp.eq.s32.totalorder %s3370_s15, 0 }
  0x45   : > { %s4513_s4 = sld [smem:[#allocation54_spill]]  ;;  %s3230_s7 = smov 128  }
  0x46   : > { %p3502_p3 = pnand %p2831_p12, %p4511_p8  ;;  %s3231_s3 = smov 8  }
  0x47   : > { %s294_s27 = sshll.u32 %s4452_s5, 4  ;;  %s3232_s21 = smov [#allocation12]   ;;  %s295_s27 = int_to_ptr.vmem [resolvable:$true] %s294_s27 }
  0x48   : > { %2834 = dma.hbm_to_vmem [thread:$0]  (!%p3502_p3), %s266_s23, 512, %s268_s10, [#allocation11], %s3230_s7, %s3230_s7, %s3231_s3  }
  0x49   : > { %s281_s28 = sshll.u32 %s3232_s21, 4  ;;  %s3233_s8 = smov [#allocation13]   ;;  %s282_s28 = int_to_ptr.vmem [resolvable:$true] %s281_s28 }
  0x4a   : > { %2840 = dma.vmem_to_smem (!%p3502_p3), %s295_s27, 128, %s3233_s8, [#allocation6]  }
  0x4b   : > { %s279_s2 = sshll.u32 %s4513_s4, 4  ;;  %s304_s15 = sshll.u32 %s4453_s6, 4  ;;  %s280_s2 = int_to_ptr.hbm [resolvable:$true] %s279_s2  ;;  %s305_s15 = int_to_ptr.hbm [resolvable:$true] %s304_s15 }
  0x4c   : > { %2837 = dma.hbm_to_vmem [thread:$0]  (!%p3502_p3), %s280_s2, 256, %s282_s28, [#allocation11], %s3230_s7, %s3230_s7, %s3231_s3  }
  0x4d   : > { %s3234_s18 = smov [#allocation14]   ;;  %p2499_p2 = scmp.ge.s32.totalorder %s3227_s14, 16 }
  0x4e   : > { %2843 = dma.hbm_to_smem (!%p3502_p3), %s305_s15, 16, %s3234_s18, [#allocation5]  }
  0x4f   : > { %311 = sbr.rel (%p2499_p2) target bundleno = 132 (0x84), region = 32 }
  0x54   : > { %s315_s3 = sand.u32 1, %s3207_s9   ;;  %s2502_s28 = sshll.u32 %s4560_s19, 1 }
  0x55   : > { %s2500_s27 = sshll.u32 %s315_s3, 6  ;;  %s3527_s21 = sshll.u32 %s3223_s13, 6 }
  0x56   : > { %s327_s4 = sadd.s32 %s3527_s21, %s2502_s28  ;;  %s319_s15 = scalar_lea.vmem [#allocation2], %s2500_s27 }
  0x57   : > { %s2504_s16 = sshll.u32 %s327_s4, 3  ;;  %s344_s18 = sshll.u32 %s319_s15, 4  ;;  %s345_s18 = int_to_ptr.vmem [resolvable:$true] %s344_s18 }
  0x58   : > { %s329_s24 = scalar_lea.hbm %s4447_s0, %s2504_s16  ;;  %s3235_s19 = smov 2048  }
  0x59   : > { %s2788_s2 = scalar_select %p3402_p7, [#allocation0], [#allocation24] }
  0x5a   : > { %2789 = sst [smem:[#allocation17]] (%p3402_p7), %s3235_s19  ;;  %s342_s25 = sshll.u32 %s329_s24, 4  ;;  %s343_s25 = int_to_ptr.hbm [resolvable:$true] %s342_s25 }
  0x5b   : > { %s334_s7 = sld [smem:[%s2788_s2]]   ;;  %s3236_s8 = smov 256  }
  0x5c   : > { %2790 = sst [smem:[#allocation17 + $0x1]] (%p3402_p7), %s3236_s8  ;;  %s3237_s22 = smov 2  }
  0x5d   : > { %2791 = sst [smem:[#allocation17 + $0x2]] (%p3402_p7), %s3237_s22  ;;  %s3238_s28 = smov 128  }
  0x5e   : > { %2792 = sst [smem:[#allocation17 + $0x3]] (%p3402_p7), %s3238_s28  ;;  %s3239_s4 = smov 8  }
  0x5f   : > { %2793 = sst [smem:[#allocation17 + $0x4]] (%p3402_p7), %s3238_s28  ;;  %s316_s15 = scalar_lea.sflag [#allocation3], %s315_s3 }
  0x60   : > { %2794 = sst [smem:[#allocation17 + $0x5]] (%p3402_p7), %s3239_s4  ;;  %s3240_s23 = smov [#allocation16]  }
  0x61   : > { %s2505_s27 = sshll.u32 %s334_s7, 26 }
  0x62   : > { %s2506_s16 = sadd.s32 134217728, %s2505_s27 }
  0x63   : > { %2795 = dma.general (%p3402_p7), %s343_s25, 1024, %s345_s18, %s316_s15, %s3240_s23, [#allocation17], %s2506_s16, 0  }
  0x64   : > { %s367_s10 = sand.u32 1, %s3227_s14   ;;  %s369_s24 = sand.u32 1, %s3195_s29  }
  0x65   : > { %s2507_s2 = sshll.u32 %s369_s24, 6  ;;  %s2508_s19 = sshll.u32 %s3219_s12, 1 }
  0x66   : > { %s376_s7 = sadd.s32 %s2508_s19, %s3527_s21  ;;  %s371_s22 = scalar_lea.vmem [#allocation7], %s2507_s2 }
  0x67   : > { %s2510_s8 = sshll.u32 %s376_s7, 3  ;;  %s393_s3 = sshll.u32 %s371_s22, 4  ;;  %s394_s3 = int_to_ptr.vmem [resolvable:$true] %s393_s3 }
  0x68   : > { %s378_s25 = scalar_lea.hbm %s4448_s1, %s2510_s8  ;;  %s3241_s27 = smov 2048  }
  0x69   : > { %s2796_s28 = scalar_select %p3433_p1, [#allocation0], [#allocation25] }
  0x6a   : > { %2797 = sst [smem:[#allocation19]] (%p3433_p1), %s3241_s27  ;;  %s391_s16 = sshll.u32 %s378_s25, 4  ;;  %s392_s16 = int_to_ptr.hbm [resolvable:$true] %s391_s16 }
  0x6b   : > { %s383_s4 = sld [smem:[%s2796_s28]]   ;;  %s3242_s15 = smov 256  }
  0x6c   : > { %2798 = sst [smem:[#allocation19 + $0x1]] (%p3433_p1), %s3242_s15  ;;  %s3243_s23 = smov 2  }
  0x6d   : > { %2799 = sst [smem:[#allocation19 + $0x2]] (%p3433_p1), %s3243_s23  ;;  %s3244_s24 = smov 128  }
  0x6e   : > { %2800 = sst [smem:[#allocation19 + $0x3]] (%p3433_p1), %s3244_s24  ;;  %s3245_s19 = smov 8  }
  0x6f   : > { %2801 = sst [smem:[#allocation19 + $0x4]] (%p3433_p1), %s3244_s24  ;;  %s3570_s8 = scalar_lea.sflag [#allocation8], %s367_s10 }
  0x70   : > { %2802 = sst [smem:[#allocation19 + $0x5]] (%p3433_p1), %s3245_s19  ;;  %s3246_s22 = smov [#allocation18]  }
  0x71   : > { %s2511_s2 = sshll.u32 %s383_s4, 26 }
  0x72   : > { %s2512_s7 = sadd.s32 134217728, %s2511_s2 }
  0x73   : > { %2803 = dma.general (%p3433_p1), %s392_s16, 1024, %s394_s3, %s3570_s8, %s3246_s22, [#allocation19], %s2512_s7, 0  }
  0x74   : > { %s418_s11 = sand.u32 1, %s3183_s26   ;;  %s2514_s18 = sshll.u32 %s4566_s17, 1 }
  0x75   : > { %s2513_s25 = sshll.u32 %s418_s11, 6  ;;  %s428_s28 = sadd.s32 %s2514_s18, %s3527_s21 }
  0x76   : > { %s2516_s27 = sshll.u32 %s428_s28, 3  ;;  %s4514_s10 = sld [smem:[#allocation52_spill]] }
  0x77   : > { %s420_s24 = scalar_lea.vmem [#allocation9], %s2513_s25  ;;  %s3247_s17 = smov 2048  }
  0x78   : > { %s445_s20 = sshll.u32 %s420_s24, 4  ;;  %2805 = sst [smem:[#allocation21]] (%p3458_p11), %s3247_s17  ;;  %s446_s20 = int_to_ptr.vmem [resolvable:$true] %s445_s20 }
  0x79   : > { %s2804_s3 = scalar_select %p3458_p11, [#allocation0], [#allocation26] }
  0x7a   : > { %s3248_s21 = smov 256   ;;  %s3249_s19 = smov 2  }
  0x7b   : > { %s435_s2 = sld [smem:[%s2804_s3]]   ;;  %s3250_s7 = smov 128  }
  0x7c   : > { %s430_s23 = scalar_lea.hbm %s4514_s10, %s2516_s27  ;;  %2806 = sst [smem:[#allocation21 + $0x1]] (%p3458_p11), %s3248_s21 }
  0x7d   : > { %s443_s16 = sshll.u32 %s430_s23, 4  ;;  %2807 = sst [smem:[#allocation21 + $0x2]] (%p3458_p11), %s3249_s19  ;;  %s444_s16 = int_to_ptr.hbm [resolvable:$true] %s443_s16 }
  0x7e   : > { %2808 = sst [smem:[#allocation21 + $0x3]] (%p3458_p11), %s3250_s7  ;;  %s3251_s18 = smov 8  }
  0x7f   : > { %2809 = sst [smem:[#allocation21 + $0x4]] (%p3458_p11), %s3250_s7  ;;  %s3252_s25 = smov [#allocation20]  }
  0x80   : > { %2810 = sst [smem:[#allocation21 + $0x5]] (%p3458_p11), %s3251_s18 }
  0x81   : > { %s2517_s22 = sshll.u32 %s435_s2, 26 }
  0x82   : > { %s2518_s11 = sadd.s32 134217728, %s2517_s22 }
  0x83   : > { %2811 = dma.general (%p3458_p11), %s444_s16, 1024, %s446_s20, %s3570_s8, %s3252_s25, [#allocation21], %s2518_s11, 0  }
  0x84 PF: > { %470 = sbr.rel (%p3491_p9) target bundleno = 742 (0x2e6), region = 48  ;;  %s4516_s27 = sld [smem:[#allocation37_spill]] (!%p3491_p9) }
  0x85   : > { %s4517_s4 = sld [smem:[#allocation44_spill]] (!%p3491_p9) }
  0x8a   : > { %s472_s15 = sand.u32 1, %s4516_s27  }
  0x8b   : > { %s2520_s10 = sshll.u32 %s472_s15, 6  ;;  %s473_s23 = scalar_lea.sflag [#allocation3], %s472_s15 }
  0x8c   : > { %s3601_s24 = scalar_lea.vmem [#allocation2], %s2520_s10  ;;  %p4518_p7 = scmp.ne.s32.totalorder %s4517_s4, 0 }
  0x8e   : > { %3146 = dma.done.wait (%p4518_p7), %s473_s23, 1024  }
  0x8f   : > { %3148 = vsyncadd (%p4518_p7), %s473_s23, 4294966272  ;;  %s4519_s3 = sld [smem:[#allocation40_spill]] }
  0x90   : > { %s4520_s2 = sld [smem:[#allocation36_spill]] }
  0x91   : > { %s4521_s30 = sld [smem:[#allocation46_spill]] }
  0x95   : > { %s482_s8 = sand.u32 1, %s4519_s3  }
  0x96   : > { %s3609_s20 = sand.u32 1, %s4520_s2   ;;  %s483_s17 = scalar_lea.sflag [#allocation8], %s482_s8 }
  0x97   : > { %s2521_s16 = sshll.u32 %s3609_s20, 6  ;;  %p4522_p9 = scmp.ne.s32.totalorder %s4521_s30, 0 }
  0x98   : > { %s3612_s21 = scalar_lea.vmem [#allocation7], %s2521_s16 }
  0x99   : > { %3150 = dma.done.wait (%p4522_p9), %s483_s17, 1024  }
  0x9a   : > { %3152 = vsyncadd (%p4522_p9), %s483_s17, 4294966272  ;;  %s4523_s19 = sld [smem:[#allocation34_spill]] }
  0xa0   : > { %s494_s22 = sand.u32 1, %s4523_s19  }
  0xa1   : > { %s2522_s11 = sshll.u32 %s494_s22, 6 }
  0xa2   : > { %s3619_s18 = scalar_lea.vmem [#allocation9], %s2522_s11 }
  0xa3   : > { %3154 = dma.done.wait (%p3464_p0), %s483_s17, 1024  }
  0xa4   : > { %3156 = vsyncadd (%p3464_p0), %s483_s17, 4294966272  ;;  %p4525_p1 = scmp.eq.s32.totalorder %s4519_s3, 0 }
  0xa6   : > { %3158 = dma.done.wait (%p4525_p1), [#allocation11], 768   ;;  %p4526_p11 = pmov %p4525_p1 }
  0xa7   : > { %p4527_p5 = pmov %p4525_p1 }
  0xa8   : > { %3160 = vsyncadd (%p4526_p11), [#allocation11], 4294966528 }
  0xa9   : > { %3162 = dma.done.wait (%p4527_p5), [#allocation6], 128   ;;  %p4528_p4 = pmov %p4525_p1 }
  0xaa   : > { %p4529_p6 = pmov %p4525_p1 }
  0xab   : > { %3164 = vsyncadd (%p4528_p4), [#allocation6], 4294967168 }
  0xac   : > { %3166 = dma.done.wait (%p4529_p6), [#allocation5], 16   ;;  %p4530_p12 = pmov %p4525_p1 }
  0xae   : > { %3168 = vsyncadd (%p4530_p12), [#allocation5], 4294967280 }
  0xaf   : > { %522 = sfence }
  0xb0   : > { %v567_v0 = vld [vmem:[%s3612_s21 + $0x8] sm:$0xff]  ;;  %s600_s25 = sld [smem:[#allocation13]]  ;;  %v2536_v2 = vld [vmem:[%s3612_s21 + $0x18] sm:$0xff]  ;;  %v566_v24 = vld [vmem:[%s3612_s21] sm:$0xff] }
  0xb1   : > { %v589_v1 = vld [vmem:[%s3619_s18 + $0x8] sm:$0xff]  ;;  %vm569_vm0 = vcmp.ge.f32.partialorder %v567_v0, 0.0  ;;  %v571_v3 = vmul.f32 0.01, %v567_v0  ;;  %vm652_vm2 = vcmp.ge.f32.partialorder %v2536_v2, 0.0  ;;  %v2540_v6 = vld [vmem:[%s3619_s18 + $0x18] sm:$0xff] }
  0xb2   : > { %vm591_vm1 = vcmp.ge.f32.partialorder %v589_v1, 0.0  ;;  %v593_v4 = vmul.f32 0.01, %v589_v1  ;;  %v654_v5 = vmul.f32 0.01, %v2536_v2  ;;  %s3641_s28 = sld [smem:[#allocation13 + $0x1]] }
  0xb3   : > { %v573_v7 = vsel %vm569_vm0, %v567_v0, %v571_v3  ;;  %vm676_vm3 = vcmp.ge.f32.partialorder %v2540_v6, 0.0  ;;  %v678_v9 = vmul.f32 0.01, %v2540_v6  ;;  %v2550_v10 = vld [vmem:[%s3612_s21 + $0x28] sm:$0xff]  ;;  %v2564_v12 = vld [vmem:[%s3612_s21 + $0x38] sm:$0xff]  ;;  %s2555_s27 = sld [smem:[#allocation13 + $0x2]] }
  0xb4   : > { %v595_v8 = vsel %vm591_vm1, %v589_v1, %v593_v4  ;;  %v2554_v11 = vld [vmem:[%s3619_s18 + $0x28] sm:$0xff]  ;;  %v3646_v13 = vmul.f32 0.75, %v573_v7  ;;  %v656_v15 = vsel %vm652_vm2, %v2536_v2, %v654_v5  ;;  %vm769_vm4 = vcmp.ge.f32.partialorder %v2550_v10, 0.0  ;;  %v2568_v16 = vld [vmem:[%s3619_s18 + $0x38] sm:$0xff]  ;;  %s2569_s4 = sld [smem:[#allocation13 + $0x3]]  ;;  %v588_v31 = vld [vmem:[%s3619_s18] sm:$0xff] }
  0xb5   : > { %v597_v14 = vmul.f32 0.25, %v595_v8  ;;  %v3649_v17 = vmul.f32 0.75, %v656_v15  ;;  %v680_v18 = vsel %vm676_vm3, %v2540_v6, %v678_v9  ;;  %v771_v19 = vmul.f32 0.01, %v2550_v10  ;;  %s1005_s15 = sld [smem:[#allocation14]]  ;;  %v2535_v39 = vld [vmem:[%s3612_s21 + $0x10] sm:$0xff] }
  0xb6   : > { %vm793_vm5 = vcmp.ge.f32.partialorder %v2554_v11, 0.0  ;;  %v3654_v21 = vstv %s600_s25  ;;  %v682_v22 = vmul.f32 0.25, %v680_v18  ;;  %v795_v23 = vmul.f32 0.01, %v2554_v11  ;;  %v2539_v43 = vld [vmem:[%s3619_s18 + $0x10] sm:$0xff]  ;;  %v2549_v48 = vld [vmem:[%s3612_s21 + $0x20] sm:$0xff] }
  0xb7   : > { %v3652_v20 = vadd.f32 %v597_v14, %v3646_v13  ;;  %v773_v25 = vsel %vm769_vm4, %v2550_v10, %v771_v19  ;;  %vm886_vm6 = vcmp.ge.f32.partialorder %v2564_v12, 0.0  ;;  %v888_v26 = vmul.f32 0.01, %v2564_v12  ;;  %s3685_s10 = sld [smem:[#allocation13 + $0x80]]  ;;  %v2553_v55 = vld [vmem:[%s3619_s18 + $0x20] sm:$0xff]  ;;  %v2563_v59 = vld [vmem:[%s3612_s21 + $0x30] sm:$0xff] }
  0xb8   : > { %vm910_vm7 = vcmp.ge.f32.partialorder %v2568_v16, 0.0  ;;  %v3660_v28 = vadd.f32 %v682_v22, %v3649_v17  ;;  %v3663_v29 = vstv %s3641_s28  ;;  %v3665_v30 = vmul.f32 0.75, %v773_v25  ;;  %s3696_s23 = sld [smem:[#allocation13 + $0x81]]  ;;  %v2567_v0 = vld [vmem:[%s3619_s18 + $0x30] sm:$0xff] }
  0xb9   : > { %v605_v27 = vmul.f32 %v3654_v21, %v3652_v20  ;;  %v797_v32 = vsel %vm793_vm5, %v2554_v11, %v795_v23  ;;  %v890_v33 = vsel %vm886_vm6, %v2564_v12, %v888_v26  ;;  %v912_v34 = vmul.f32 0.01, %v2568_v16  ;;  %s3700_s3 = sld [smem:[#allocation13 + $0x82]] }
  0xba   : > { %vm568_vm8 = vcmp.ge.f32.partialorder %v566_v24, 0.0  ;;  %v690_v35 = vmul.f32 %v3663_v29, %v3660_v28  ;;  %v799_v36 = vmul.f32 0.25, %v797_v32  ;;  %v3671_v37 = vstv %s2555_s27  ;;  %s3707_s2 = sld [smem:[#allocation13 + $0x83]]  ;;  %v577_v32 = vld [vmem:[%s3601_s24 + $0x8] sm:$0xff] }
  0xbb   : > { %v3673_v38 = vmul.f32 0.75, %v890_v33  ;;  %v914_v40 = vsel %vm910_vm7, %v2568_v16, %v912_v34  ;;  %v3676_v41 = vstv %s2569_s4  ;;  %v570_v42 = vmul.f32 0.01, %v566_v24  ;;  %s3712_s30 = sld [smem:[#allocation14 + $0x1]] }
  0xbc   : > { %vm590_vm9 = vcmp.ge.f32.partialorder %v588_v31, 0.0  ;;  %v694_v44 = vadd.f32 %v690_v35, %v605_v27  ;;  %v3680_v45 = vadd.f32 %v799_v36, %v3665_v30  ;;  %v916_v46 = vmul.f32 0.25, %v914_v40  ;;  %s3801_s8 = sld [smem:[#allocation13 + $0x101]] }
  0xbd   : > { %v3682_v47 = vstv %s1005_s15  ;;  %v572_v49 = vsel %vm568_vm8, %v566_v24, %v570_v42  ;;  %v592_v50 = vmul.f32 0.01, %v588_v31  ;;  %vm651_vm10 = vcmp.ge.f32.partialorder %v2535_v39, 0.0  ;;  %s3810_s16 = sld [smem:[#allocation13 + $0x102]] }
  0xbe   : > { %v653_v51 = vmul.f32 0.01, %v2535_v39  ;;  %v807_v52 = vmul.f32 %v3671_v37, %v3680_v45  ;;  %v3691_v53 = vadd.f32 %v916_v46, %v3673_v38  ;;  %v3693_v54 = vmul.f32 0.75, %v572_v49  ;;  %v2552_v46 = vld [vmem:[%s3601_s24 + $0x28] sm:$0xff]  ;;  %s3821_s17 = sld [smem:[#allocation13 + $0x103]] }
  0xbf   : > { %vm675_vm11 = vcmp.ge.f32.partialorder %v2539_v43, 0.0  ;;  %v594_v56 = vsel %vm590_vm9, %v588_v31, %v592_v50  ;;  %v677_v58 = vmul.f32 0.01, %v2539_v43  ;;  %vm768_vm12 = vcmp.ge.f32.partialorder %v2549_v48, 0.0  ;;  %s2622_s21 = sld [smem:[#allocation14 + $0x2]] }
  0xc0   : > { %v655_v57 = vsel %vm651_vm10, %v2535_v39, %v653_v51  ;;  %v811_v60 = vadd.f32 %v807_v52, %v694_v44  ;;  %v924_v61 = vmul.f32 %v3676_v41, %v3691_v53  ;;  %v596_v62 = vmul.f32 0.25, %v594_v56  ;;  %v2538_v39 = vld [vmem:[%s3601_s24 + $0x18] sm:$0xff]  ;;  %s2530_s19 = sld [smem:[#allocation13 + $0x180]] }
  0xc1   : > { %v3704_v63 = vmul.f32 0.75, %v655_v57  ;;  %v679_v1 = vsel %vm675_vm11, %v2539_v43, %v677_v58  ;;  %v770_v2 = vmul.f32 0.01, %v2549_v48  ;;  %vm792_vm13 = vcmp.ge.f32.partialorder %v2553_v55, 0.0  ;;  %v2566_v51 = vld [vmem:[%s3601_s24 + $0x38] sm:$0xff]  ;;  %s2544_s7 = sld [smem:[#allocation13 + $0x181]] }
  0xc2   : > { %v794_v3 = vmul.f32 0.01, %v2553_v55  ;;  %v928_v4 = vadd.f32 %v924_v61, %v811_v60  ;;  %v3710_v5 = vadd.f32 %v596_v62, %v3693_v54  ;;  %v681_v6 = vmul.f32 0.25, %v679_v1  ;;  %v576_v60 = vld [vmem:[%s3601_s24] sm:$0xff]  ;;  %s2558_s22 = sld [smem:[#allocation13 + $0x182]] }
  0xc3   : > { %vm885_vm14 = vcmp.ge.f32.partialorder %v2563_v59, 0.0  ;;  %v772_v7 = vsel %vm768_vm12, %v2549_v48, %v770_v2  ;;  %v887_v9 = vmul.f32 0.01, %v2563_v59  ;;  %vm909_vm15 = vcmp.ge.f32.partialorder %v2567_v0, 0.0  ;;  %s2572_s11 = sld [smem:[#allocation13 + $0x183]] }
  0xc4   : > { %v796_v8 = vsel %vm792_vm13, %v2553_v55, %v794_v3  ;;  %v1010_v10 = vadd.f32 %v3682_v47, %v928_v4  ;;  %v604_v11 = vmul.f32 %v3654_v21, %v3710_v5  ;;  %v3719_v12 = vadd.f32 %v681_v6, %v3704_v63  ;;  %v2537_v6 = vld [vmem:[%s3601_s24 + $0x10] sm:$0xff]  ;;  %s2647_s18 = sld [smem:[#allocation14 + $0x3]] }
  0xc5   : > { %v3721_v14 = vmul.f32 0.75, %v772_v7  ;;  %v798_v15 = vmul.f32 0.25, %v796_v8  ;;  %v889_v16 = vsel %vm885_vm14, %v2563_v59, %v887_v9  ;;  %v911_v18 = vmul.f32 0.01, %v2567_v0  ;;  %s2531_s25 = sld [smem:[#allocation13 + $0x200]] }
  0xc6   : > { %1108 = vmatpush.msra.mxu2 %v1010_v10  ;;  %v689_v19 = vmul.f32 %v3663_v29, %v3719_v12  ;;  %v3725_v22 = vmul.f32 0.75, %v889_v16  ;;  %v3728_v23 = vstv %s3685_s10  ;;  %v3731_v24 = vstv %s3696_s23  ;;  %v2551_v10 = vld [vmem:[%s3601_s24 + $0x20] sm:$0xff]  ;;  %s2545_s28 = sld [smem:[#allocation13 + $0x201]] }
  0xc7   : > { %v3734_v25 = vadd.f32 %v798_v15, %v3721_v14  ;;  %v913_v26 = vsel %vm909_vm15, %v2567_v0, %v911_v18  ;;  %v611_v27 = vmul.f32 %v3728_v23, %v3652_v20  ;;  %v700_v31 = vmul.f32 %v3731_v24, %v3660_v28  ;;  %v3772_v15 = vld [vmem:[#allocation10] sm:$0xff]  ;;  %s2559_s27 = sld [smem:[#allocation13 + $0x202]] }
  0xc8   : > { %v693_v33 = vadd.f32 %v689_v19, %v604_v11  ;;  %v915_v34 = vmul.f32 0.25, %v913_v26  ;;  %vm1011_vm0 = vcmask 130048   ;;  %v3742_v35 = vstv %s3700_s3  ;;  %s2573_s4 = sld [smem:[#allocation13 + $0x203]] }
  0xc9   : > { %v3745_v36 = vstv %s3707_s2  ;;  %v806_v40 = vmul.f32 %v3671_v37, %v3734_v25  ;;  %v704_v42 = vadd.f32 %v700_v31, %v611_v27  ;;  %v817_v43 = vmul.f32 %v3742_v35, %v3680_v45  ;;  %v2565_v31 = vld [vmem:[%s3601_s24 + $0x30] sm:$0xff]  ;;  %s3797_s24 = sld [smem:[#allocation13 + $0x100]] }
  0xca   : > { %v934_v44 = vmul.f32 %v3745_v36, %v3691_v53  ;;  %v3756_v48 = vadd.f32 %v915_v34, %v3725_v22  ;;  %v3759_v49 = vstv %s3712_s30  ;;  %vm579_vm1 = vcmp.ge.f32.partialorder %v577_v32, 0.0  ;;  %s2672_s15 = sld [smem:[#allocation14 + $0x4]] }
  0xcb   : > { %v581_v50 = vmul.f32 0.01, %v577_v32  ;;  %v810_v52 = vadd.f32 %v806_v40, %v693_v33  ;;  %v821_v55 = vadd.f32 %v817_v43, %v704_v42  ;;  %vm663_vm2 = vcmp.ge.f32.partialorder %v2538_v39, 0.0  ;;  %s2532_s10 = sld [smem:[#allocation13 + $0x280]] }
  0xcc   : > { %v665_v56 = vmul.f32 0.01, %v2538_v39  ;;  %v923_v57 = vmul.f32 %v3676_v41, %v3756_v48  ;;  %vm780_vm3 = vcmp.ge.f32.partialorder %v2552_v46, 0.0  ;;  %v782_v59 = vmul.f32 0.01, %v2552_v46  ;;  %s2546_s23 = sld [smem:[#allocation13 + $0x281]] }
  0xcd   : > { %v583_v58 = vsel %vm579_vm1, %v577_v32, %v581_v50  ;;  %v938_v61 = vadd.f32 %v934_v44, %v821_v55  ;;  %vm897_vm4 = vcmp.ge.f32.partialorder %v2566_v51, 0.0  ;;  %v899_v4 = vmul.f32 0.01, %v2566_v51  ;;  %s2560_s3 = sld [smem:[#allocation13 + $0x282]] }
  0xce   : > { %v585_v62 = vmul.f32 0.25, %v583_v58  ;;  %v667_v0 = vsel %vm663_vm2, %v2538_v39, %v665_v56  ;;  %v927_v1 = vadd.f32 %v923_v57, %v810_v52  ;;  %v784_v3 = vsel %vm780_vm3, %v2552_v46, %v782_v59  ;;  %s2574_s2 = sld [smem:[#allocation13 + $0x283]] }
  0xcf   : > { %v669_v2 = vmul.f32 0.25, %v667_v0  ;;  %v1179_v7 = vadd.f32 %v3759_v49, %v938_v61  ;;  %v786_v9 = vmul.f32 0.25, %v784_v3  ;;  %vm578_vm5 = vcmp.ge.f32.partialorder %v576_v60, 0.0  ;;  %v3812_v61 = vld [vmem:[#allocation10 + $0x8] sm:$0xff]  ;;  %s2697_s30 = sld [smem:[#allocation14 + $0x5]] }
  0xd0   : > { %v3768_v8 = vadd.f32 %v585_v62, %v3646_v13  ;;  %v1009_v11 = vadd.f32 %v3682_v47, %v927_v1  ;;  %v901_v18 = vsel %vm897_vm4, %v2566_v51, %v899_v4  ;;  %v580_v19 = vmul.f32 0.01, %v576_v60 }
  0xd1   : > { %v3775_v16 = vadd.f32 %v669_v2, %v3649_v17  ;;  %v3780_v27 = vadd.f32 %v786_v9, %v3665_v30  ;;  %v903_v13 = vmul.f32 0.25, %v901_v18  ;;  %vm662_vm6 = vcmp.ge.f32.partialorder %v2537_v6, 0.0 }
  0xd2   : > { %v603_v26 = vmul.f32 %v3654_v21, %v3768_v8  ;;  %1109 = vmatpush.msra.mxu2 %v1009_v11  ;;  %v582_v33 = vsel %vm578_vm5, %v576_v60, %v580_v19  ;;  %v664_v34 = vmul.f32 0.01, %v2537_v6  ;;  %vm779_vm7 = vcmp.ge.f32.partialorder %v2551_v10, 0.0 }
  0xd3   : > { %v688_v32 = vmul.f32 %v3663_v29, %v3775_v16  ;;  %2585 = vmatmul.msk.f32.vlgmr.msra.gmra.mxu2 %vm1011_vm0, %v3772_v15  ;;  %v805_v17 = vmul.f32 %v3671_v37, %v3780_v27  ;;  %v3790_v39 = vadd.f32 %v903_v13, %v3673_v38  ;;  %v584_v30 = vmul.f32 0.25, %v582_v33 }
  0xd4   : > { %v781_v40 = vmul.f32 0.01, %v2551_v10  ;;  %1264 = vmatpush.msrb.mxu2 %v1179_v7  ;;  %v666_v43 = vsel %vm662_vm6, %v2537_v6, %v664_v34  ;;  %vm896_vm8 = vcmp.ge.f32.partialorder %v2565_v31, 0.0  ;;  %v898_v44 = vmul.f32 0.01, %v2565_v31 }
  0xd5   : > { %v692_v42 = vadd.f32 %v688_v32, %v603_v26  ;;  %v922_v46 = vmul.f32 %v3676_v41, %v3790_v39  ;;  %v3795_v50 = vadd.f32 %v584_v30, %v3693_v54  ;;  %v668_v51 = vmul.f32 0.25, %v666_v43 }
  0xd6   : > { %v783_v52 = vsel %vm779_vm7, %v2551_v10, %v781_v40  ;;  %v900_v56 = vsel %vm896_vm8, %v2565_v31, %v898_v44  ;;  %v609_v57 = vmul.f32 %v3728_v23, %v3768_v8  ;;  %v698_v60 = vmul.f32 %v3731_v24, %v3775_v16 }
  0xd7   : > { %v809_v55 = vadd.f32 %v805_v17, %v692_v42  ;;  %v785_v38 = vmul.f32 0.25, %v783_v52  ;;  %v602_v58 = vmul.f32 %v3654_v21, %v3795_v50  ;;  %v3806_v59 = vadd.f32 %v668_v51, %v3704_v63  ;;  %v3856_v42 = vld [vmem:[#allocation10 + $0x10] sm:$0xff] }
  0xd8   : > { %v902_v54 = vmul.f32 0.25, %v900_v56  ;;  %v815_v1 = vmul.f32 %v3742_v35, %v3780_v27  ;;  %v932_v21 = vmul.f32 %v3745_v36, %v3790_v39  ;;  %v702_v3 = vadd.f32 %v698_v60, %v609_v57 }
  0xd9   : > { %v926_v62 = vadd.f32 %v922_v46, %v809_v55  ;;  %v3815_v0 = vadd.f32 %v785_v38, %v3721_v14  ;;  %v687_v63 = vmul.f32 %v3663_v29, %v3806_v59  ;;  %v610_v4 = vmul.f32 %v3728_v23, %v3710_v5 }
  0xda   : > { %v3826_v2 = vadd.f32 %v902_v54, %v3725_v22  ;;  %v699_v7 = vmul.f32 %v3731_v24, %v3719_v12  ;;  %v816_v9 = vmul.f32 %v3742_v35, %v3734_v25  ;;  %v819_v10 = vadd.f32 %v815_v1, %v702_v3 }
  0xdb   : > { %v1008_v14 = vadd.f32 %v3682_v47, %v926_v62  ;;  %v804_v6 = vmul.f32 %v3671_v37, %v3815_v0  ;;  %2586 = vmatmul.msk.f32.gmra.mxu2 %vm1011_vm0, %v3812_v61  ;;  %v691_v29 = vadd.f32 %v687_v63, %v602_v58  ;;  %v933_v11 = vmul.f32 %v3745_v36, %v3756_v48 }
  0xdc   : > { %v921_v22 = vmul.f32 %v3676_v41, %v3826_v2  ;;  %v703_v37 = vadd.f32 %v699_v7, %v610_v4  ;;  %v608_v18 = vmul.f32 %v3728_v23, %v3795_v50  ;;  %v697_v19 = vmul.f32 %v3731_v24, %v3806_v59 }
  0xdd   : > { %1038 = vmatpush.msra.mxu0 %v1008_v14  ;;  %v814_v26 = vmul.f32 %v3742_v35, %v3815_v0  ;;  %v808_v41 = vadd.f32 %v804_v6, %v691_v29  ;;  %v936_v13 = vadd.f32 %v932_v21, %v819_v10  ;;  %v931_v31 = vmul.f32 %v3745_v36, %v3826_v2  ;;  %v3876_v6 = vld [vmem:[#allocation10 + $0x18] sm:$0xff] }
  0xde   : > { %v613_v32 = vstv %s3797_s24  ;;  %v820_v33 = vadd.f32 %v816_v9, %v703_v37  ;;  %v701_v34 = vadd.f32 %v697_v19, %v608_v18  ;;  %v706_v30 = vstv %s3801_s8  ;;  %s2533_s24 = sld [smem:[#allocation13 + $0x300]] }
  0xdf   : > { %v617_v17 = vmul.f32 %v613_v32, %v3652_v20  ;;  %v925_v23 = vadd.f32 %v921_v22, %v808_v41  ;;  %v710_v40 = vmul.f32 %v706_v30, %v3660_v28  ;;  %v823_v24 = vstv %s3810_s16  ;;  %s2547_s8 = sld [smem:[#allocation13 + $0x301]] }
  0xe0   : > { %v937_v35 = vadd.f32 %v933_v11, %v820_v33  ;;  %v818_v43 = vadd.f32 %v814_v26, %v701_v34  ;;  %v827_v44 = vmul.f32 %v823_v24, %v3680_v45  ;;  %v940_v46 = vstv %s3821_s17  ;;  %s2561_s16 = sld [smem:[#allocation13 + $0x302]] }
  0xe1   : > { %v1007_v51 = vadd.f32 %v3682_v47, %v925_v23  ;;  %v1177_v36 = vadd.f32 %v3759_v49, %v936_v13  ;;  %v714_v52 = vadd.f32 %v710_v40, %v617_v17  ;;  %v944_v55 = vmul.f32 %v940_v46, %v3691_v53  ;;  %s2575_s17 = sld [smem:[#allocation13 + $0x303]] }
  0xe2   : > { %v1178_v38 = vadd.f32 %v3759_v49, %v937_v35  ;;  %v935_v56 = vadd.f32 %v931_v31, %v818_v43  ;;  %v1331_v47 = vstv %s2622_s21  ;;  %v615_v54 = vmul.f32 %v613_v32, %v3768_v8  ;;  %s2722_s21 = sld [smem:[#allocation14 + $0x6]] }
  0xe3   : > { %1039 = vmatpush.msra.mxu0 %v1007_v51  ;;  %2587 = vmatmul.msk.f32.gmra.mxu2 %vm1011_vm0, %v3856_v42  ;;  %v831_v57 = vadd.f32 %v827_v44, %v714_v52  ;;  %v708_v60 = vmul.f32 %v706_v30, %v3775_v16  ;;  %v825_v1 = vmul.f32 %v823_v24, %v3780_v27  ;;  %v619_v31 = vstv %s2530_s19  ;;  %s2534_s19 = sld [smem:[#allocation13 + $0x380]] }
  0xe4   : > { %2577 = vmatmul.msk.f32.vlgmr.msra.gmra.mxu0 %vm1011_vm0, %v3772_v15  ;;  %1265 = vmatpush.msrb.mxu2 %v1178_v38  ;;  %v1176_v58 = vadd.f32 %v3759_v49, %v935_v56  ;;  %v616_v21 = vmul.f32 %v613_v32, %v3710_v5  ;;  %v942_v3 = vmul.f32 %v940_v46, %v3790_v39  ;;  %v716_v33 = vstv %s2544_s7  ;;  %s2548_s7 = sld [smem:[#allocation13 + $0x381]] }
  0xe5   : > { %1194 = vmatpush.msrb.mxu0 %v1177_v36  ;;  %v948_v62 = vadd.f32 %v944_v55, %v831_v57  ;;  %v712_v63 = vadd.f32 %v708_v60, %v615_v54  ;;  %v709_v4 = vmul.f32 %v706_v30, %v3719_v12  ;;  %v826_v14 = vmul.f32 %v823_v24, %v3734_v25 }
  0xe6   : > { %v943_v29 = vmul.f32 %v940_v46, %v3756_v48  ;;  %v614_v19 = vmul.f32 %v613_v32, %v3795_v50  ;;  %v707_v26 = vmul.f32 %v706_v30, %v3806_v59  ;;  %v824_v41 = vmul.f32 %v823_v24, %v3815_v0 }
  0xe7   : > { %1195 = vmatpush.msrb.mxu0 %v1176_v58  ;;  %v1335_v49 = vadd.f32 %v1331_v47, %v948_v62  ;;  %v829_v7 = vadd.f32 %v825_v1, %v712_v63  ;;  %v713_v9 = vadd.f32 %v709_v4, %v616_v21  ;;  %v941_v13 = vmul.f32 %v940_v46, %v3826_v2 }
  0xe8   : > { %v833_v34 = vstv %s2558_s22  ;;  %v950_v17 = vstv %s2572_s11  ;;  %v711_v23 = vadd.f32 %v707_v26, %v614_v19  ;;  %v623_v40 = vmul.f32 %v619_v31, %v3652_v20  ;;  %s2562_s22 = sld [smem:[#allocation13 + $0x382]] }
  0xe9   : > { %1420 = vmatpush.msra.mxu2 %v1335_v49  ;;  %v946_v22 = vadd.f32 %v942_v3, %v829_v7  ;;  %v830_v10 = vadd.f32 %v826_v14, %v713_v9  ;;  %v720_v35 = vmul.f32 %v716_v33, %v3660_v28  ;;  %v837_v43 = vmul.f32 %v833_v34, %v3680_v45  ;;  %s2576_s11 = sld [smem:[#allocation13 + $0x383]] }
  0xea   : > { %v828_v44 = vadd.f32 %v824_v41, %v711_v23  ;;  %v954_v32 = vmul.f32 %v950_v17, %v3691_v53  ;;  %v1487_v24 = vstv %s2647_s18  ;;  %v621_v38 = vmul.f32 %v619_v31, %v3768_v8  ;;  %s2747_s18 = sld [smem:[#allocation14 + $0x7]] }
  0xeb   : > { %2588 = vmatmul.msk.f32.gmra.mxu2 %vm1011_vm0, %v3876_v6  ;;  %v1333_v11 = vadd.f32 %v1331_v47, %v946_v22  ;;  %v947_v37 = vadd.f32 %v943_v29, %v830_v10  ;;  %v724_v51 = vadd.f32 %v720_v35, %v623_v40  ;;  %v718_v56 = vmul.f32 %v716_v33, %v3775_v16 }
  0xec   : > { %2578 = vmatmul.msk.f32.gmra.mxu0 %vm1011_vm0, %v3812_v61  ;;  %v945_v30 = vadd.f32 %v941_v13, %v828_v44  ;;  %v835_v57 = vmul.f32 %v833_v34, %v3780_v27  ;;  %v622_v58 = vmul.f32 %v619_v31, %v3710_v5  ;;  %v836_v54 = vmul.f32 %v833_v34, %v3734_v25 }
  0xed   : > { %1350 = vmatpush.msra.mxu0 %v1333_v11  ;;  %v1334_v18 = vadd.f32 %v1331_v47, %v947_v37  ;;  %v841_v36 = vadd.f32 %v837_v43, %v724_v51  ;;  %v722_v60 = vadd.f32 %v718_v56, %v621_v38  ;;  %v952_v62 = vmul.f32 %v950_v17, %v3790_v39 }
  0xee   : > { %v1332_v46 = vadd.f32 %v1331_v47, %v945_v30  ;;  %v719_v47 = vmul.f32 %v716_v33, %v3719_v12  ;;  %v953_v21 = vmul.f32 %v950_v17, %v3756_v48  ;;  %v620_v9 = vmul.f32 %v619_v31, %v3795_v50 }
  0xef   : > { %1421 = vmatpush.msra.mxu2 %v1334_v18  ;;  %v958_v52 = vadd.f32 %v954_v32, %v841_v36  ;;  %v839_v63 = vadd.f32 %v835_v57, %v722_v60  ;;  %v717_v29 = vmul.f32 %v716_v33, %v3806_v59  ;;  %v834_v22 = vmul.f32 %v833_v34, %v3815_v0 }
  0xf0   : > { %1351 = vmatpush.msra.mxu0 %v1332_v46  ;;  %v723_v1 = vadd.f32 %v719_v47, %v622_v58  ;;  %v951_v10 = vmul.f32 %v950_v17, %v3826_v2  ;;  %v625_v11 = vstv %s2531_s25  ;;  %v726_v37 = vstv %s2545_s28  ;;  %s2527_s25 = sshll.u32 %s3609_s20, 9 }
  0xf1   : > { %v1491_v55 = vadd.f32 %v1487_v24, %v958_v52  ;;  %v956_v4 = vadd.f32 %v952_v62, %v839_v63  ;;  %v843_v18 = vstv %s2559_s27  ;;  %v960_v19 = vstv %s2573_s4  ;;  %s4205_s28 = scalar_lea.vmem [#allocation15], %s2527_s25  ;;  %s2267_s27 = scalar_lea.sflag [#allocation4], %s3609_s20 }
  0xf2   : > { %v840_v3 = vadd.f32 %v836_v54, %v723_v1  ;;  %v721_v26 = vadd.f32 %v717_v29, %v620_v9  ;;  %v629_v41 = vmul.f32 %v625_v11, %v3652_v20  ;;  %v730_v13 = vmul.f32 %v726_v37, %v3660_v28 }
  0xf3   : > { %2606 = vmatmul.msk.f32.vlgmr.msrb.gmra.mxu2 %vm1011_vm0, %v3772_v15  ;;  %v1489_v49 = vadd.f32 %v1487_v24, %v956_v4  ;;  %v847_v23 = vmul.f32 %v843_v18, %v3680_v45  ;;  %v964_v31 = vmul.f32 %v960_v19, %v3691_v53  ;;  %v3929_v34 = vstv %s2672_s15 }
  0xf4   : > { %2579 = vmatmul.msk.f32.gmra.mxu0 %vm1011_vm0, %v3856_v42  ;;  %1576 = vmatpush.msrb.mxu2 %v1491_v55  ;;  %v957_v14 = vadd.f32 %v953_v21, %v840_v3  ;;  %v838_v40 = vadd.f32 %v834_v22, %v721_v26  ;;  %v734_v35 = vadd.f32 %v730_v13, %v629_v41  ;;  %v853_v9 = vstv %s2560_s3 }
  0xf5   : > { %v627_v32 = vmul.f32 %v625_v11, %v3768_v8  ;;  %v728_v30 = vmul.f32 %v726_v37, %v3775_v16  ;;  %v845_v36 = vmul.f32 %v843_v18, %v3780_v27  ;;  %v628_v46 = vmul.f32 %v625_v11, %v3710_v5 }
  0xf6   : > { %v1490_v7 = vadd.f32 %v1487_v24, %v957_v14  ;;  %v955_v33 = vadd.f32 %v951_v10, %v838_v40  ;;  %v851_v43 = vadd.f32 %v847_v23, %v734_v35  ;;  %v846_v52 = vmul.f32 %v843_v18, %v3734_v25  ;;  %v3960_v14 = vld [vmem:[#allocation12 + $0x8] sm:$0xff] }
  0xf7   : > { %v732_v55 = vadd.f32 %v728_v30, %v627_v32  ;;  %v962_v38 = vmul.f32 %v960_v19, %v3790_v39  ;;  %v963_v57 = vmul.f32 %v960_v19, %v3756_v48  ;;  %v626_v21 = vmul.f32 %v625_v11, %v3795_v50  ;;  %1149 = vmatpush.msra.mxu3 %v3960_v14 }
  0xf8   : > { %1577 = vmatpush.msrb.mxu2 %v1490_v7  ;;  %v1488_v17 = vadd.f32 %v1487_v24, %v955_v33  ;;  %v968_v44 = vadd.f32 %v964_v31, %v851_v43  ;;  %v729_v24 = vmul.f32 %v726_v37, %v3719_v12  ;;  %v727_v63 = vmul.f32 %v726_v37, %v3806_v59 }
  0xf9   : > { %v849_v58 = vadd.f32 %v845_v36, %v732_v55  ;;  %v844_v3 = vmul.f32 %v843_v18, %v3815_v0  ;;  %v961_v4 = vmul.f32 %v960_v19, %v3826_v2  ;;  %v736_v7 = vstv %s2546_s23  ;;  %1079 = vmatpush.msra.mxu1 %v3960_v14  ;;  %v3967_v18 = vld [vmem:[#allocation12] sm:$0xff] }
  0xfa   : > { %v1647_v51 = vadd.f32 %v3929_v34, %v968_v44  ;;  %v733_v56 = vadd.f32 %v729_v24, %v628_v46  ;;  %v970_v29 = vstv %s2574_s2  ;;  %v731_v22 = vadd.f32 %v727_v63, %v626_v21  ;;  %1150 = vmatpush.msra.mxu3 %v3967_v18 }
  0xfb   : > { %2607 = vmatmul.msk.f32.gmra.mxu2 %vm1011_vm0, %v3812_v61  ;;  %v966_v54 = vadd.f32 %v962_v38, %v849_v58  ;;  %v740_v11 = vmul.f32 %v736_v7, %v3660_v28  ;;  %v857_v37 = vmul.f32 %v853_v9, %v3680_v45  ;;  %1080 = vmatpush.msra.mxu1 %v3967_v18  ;;  %v1799_v40 = vstv %s2697_s30 }
  0xfc   : > { %2580 = vmatmul.msk.f32.gmra.mxu0 %vm1011_vm0, %v3876_v6  ;;  %v850_v47 = vadd.f32 %v846_v52, %v733_v56  ;;  %v848_v19 = vadd.f32 %v844_v3, %v731_v22  ;;  %v974_v41 = vmul.f32 %v970_v29, %v3691_v53  ;;  %1305 = vmatpush.msrb.mxu3 %v3960_v14  ;;  %v4007_v21 = vstv %s2547_s8 }
  0xfd   : > { %v1645_v62 = vadd.f32 %v3929_v34, %v966_v54  ;;  %1235 = vmatpush.msrb.mxu1 %v3960_v14  ;;  %v855_v44 = vmul.f32 %v853_v9, %v3780_v27  ;;  %v856_v32 = vmul.f32 %v853_v9, %v3734_v25  ;;  %v972_v36 = vmul.f32 %v970_v29, %v3790_v39 }
  0xfe   : > { %v967_v60 = vadd.f32 %v963_v57, %v850_v47  ;;  %v965_v13 = vadd.f32 %v961_v4, %v848_v19  ;;  %1306 = vmatpush.msrb.mxu3 %v3967_v18  ;;  %v973_v24 = vmul.f32 %v970_v29, %v3756_v48  ;;  %v737_v54 = vmul.f32 %v736_v7, %v3806_v59 }
  0xff   : > { %1236 = vmatpush.msrb.mxu1 %v3967_v18  ;;  %v4009_v63 = vstv %s2561_s16  ;;  %v4011_v3 = vstv %s2575_s17  ;;  %vm1164_vm9 = vcmask 261120  }
 0x100   : > { %v1646_v1 = vadd.f32 %v3929_v34, %v967_v60  ;;  %v1644_v35 = vadd.f32 %v3929_v34, %v965_v13  ;;  %v739_v34 = vmul.f32 %v736_v7, %v3719_v12  ;;  %v854_v60 = vmul.f32 %v853_v9, %v3815_v0 }
 0x103   : > { %2608 = vmatmul.msk.f32.gmra.mxu2 %vm1011_vm0, %v3856_v42 }
 0x104   : > { %2598 = vmatmul.msk.f32.vlgmr.msrb.gmra.mxu0 %vm1011_vm0, %v3772_v15 }
 0x105   : > { %1506 = vmatpush.msrb.mxu0 %v1489_v49  ;;  %v631_v49 = vstv %s2532_s10 }
 0x106   : > { %v635_v10 = vmul.f32 %v631_v49, %v3652_v20  ;;  %v633_v43 = vmul.f32 %v631_v49, %v3768_v8  ;;  %v632_v47 = vmul.f32 %v631_v49, %v3795_v50 }
 0x107   : > { %1507 = vmatpush.msrb.mxu0 %v1488_v17  ;;  %v738_v17 = vmul.f32 %v736_v7, %v3775_v16  ;;  %v867_v7 = vmul.f32 %v4009_v63, %v3680_v45 }
 0x108   : > { %v744_v26 = vadd.f32 %v740_v11, %v635_v10  ;;  %v741_v22 = vadd.f32 %v737_v54, %v632_v47  ;;  %v984_v11 = vmul.f32 %v4011_v3, %v3691_v53 }
 0x109   : > { %v742_v30 = vadd.f32 %v738_v17, %v633_v43  ;;  %v865_v43 = vmul.f32 %v4009_v63, %v3780_v27 }
 0x10a   : > { %v861_v23 = vadd.f32 %v857_v37, %v744_v26  ;;  %v858_v9 = vadd.f32 %v854_v60, %v741_v22  ;;  %v4026_v26 = vstv %s2722_s21  ;;  %v981_v22 = vmul.f32 %v4011_v3, %v3826_v2 }
 0x10b   : > { %2609 = vmatmul.msk.f32.gmra.mxu2 %vm1011_vm0, %v3876_v6  ;;  %v859_v52 = vadd.f32 %v855_v44, %v742_v30  ;;  %v749_v44 = vmul.f32 %v4007_v21, %v3719_v12  ;;  %v982_v30 = vmul.f32 %v4011_v3, %v3790_v39 }
 0x10c   : > { %2599 = vmatmul.msk.f32.gmra.mxu0 %vm1011_vm0, %v3812_v61  ;;  %v978_v31 = vadd.f32 %v974_v41, %v861_v23 }
 0x10d   : > { %v976_v38 = vadd.f32 %v972_v36, %v859_v52 }
 0x10e   : > { %v1803_v33 = vadd.f32 %v1799_v40, %v978_v31 }
 0x10f   : > { %v1801_v57 = vadd.f32 %v1799_v40, %v976_v38 }
 0x113   : > { %2631 = vmatmul.msk.f32.vlgmr.msra.gmra.mxu2 %vm1011_vm0, %v3772_v15 }
 0x114   : > { %2600 = vmatmul.msk.f32.gmra.mxu0 %vm1011_vm0, %v3856_v42  ;;  %1732 = vmatpush.msra.mxu2 %v1647_v51  ;;  %v634_v51 = vmul.f32 %v631_v49, %v3710_v5  ;;  %v750_v49 = vmul.f32 %v4007_v21, %v3660_v28 }
 0x116   : > { %1733 = vmatpush.msra.mxu2 %v1646_v1  ;;  %v743_v46 = vadd.f32 %v739_v34, %v634_v51  ;;  %v4005_v1 = vstv %s2533_s24  ;;  %v866_v51 = vmul.f32 %v4009_v63, %v3734_v25 }
 0x117   : > { %v641_v10 = vmul.f32 %v4005_v1, %v3652_v20  ;;  %v640_v17 = vmul.f32 %v4005_v1, %v3710_v5  ;;  %v638_v60 = vmul.f32 %v4005_v1, %v3795_v50 }
 0x118   : > { %v860_v55 = vadd.f32 %v856_v32, %v743_v46  ;;  %v983_v46 = vmul.f32 %v4011_v3, %v3756_v48 }
 0x119   : > { %v753_v36 = vadd.f32 %v749_v44, %v640_v17 }
 0x11a   : > { %v977_v56 = vadd.f32 %v973_v24, %v860_v55 }
 0x11b   : > { %2632 = vmatmul.msk.f32.gmra.mxu2 %vm1011_vm0, %v3812_v61  ;;  %v870_v55 = vadd.f32 %v866_v51, %v753_v36 }
 0x11c   : > { %2601 = vmatmul.msk.f32.gmra.mxu0 %vm1011_vm0, %v3876_v6  ;;  %v1802_v58 = vadd.f32 %v1799_v40, %v977_v56 }
 0x11d   : > { %v987_v56 = vadd.f32 %v983_v46, %v870_v55 }
 0x123   : > { %2633 = vmatmul.msk.f32.gmra.mxu2 %vm1011_vm0, %v3856_v42 }
 0x124   : > { %2623 = vmatmul.msk.f32.vlgmr.msra.gmra.mxu0 %vm1011_vm0, %v3772_v15 }
 0x125   : > { %1662 = vmatpush.msra.mxu0 %v1645_v62  ;;  %v971_v62 = vmul.f32 %v970_v29, %v3826_v2  ;;  %v754_v29 = vadd.f32 %v750_v49, %v641_v10  ;;  %v4077_v10 = vstv %s2534_s19  ;;  %v4079_v49 = vstv %s2548_s7 }
 0x126   : > { %v759_v17 = vmul.f32 %v4079_v49, %v3719_v12 }
 0x127   : > { %1663 = vmatpush.msra.mxu0 %v1644_v35  ;;  %v975_v37 = vadd.f32 %v971_v62, %v858_v9  ;;  %v871_v19 = vadd.f32 %v867_v7, %v754_v29  ;;  %v747_v62 = vmul.f32 %v4007_v21, %v3806_v59  ;;  %v4081_v7 = vstv %s2562_s22 }
 0x128   : > { %v4083_v9 = vstv %s2576_s11  ;;  %v876_v44 = vmul.f32 %v4081_v7, %v3734_v25  ;;  %v874_v55 = vmul.f32 %v4081_v7, %v3815_v0 }
 0x129   : > { %v1800_v41 = vadd.f32 %v1799_v40, %v975_v37  ;;  %v988_v13 = vadd.f32 %v984_v11, %v871_v19  ;;  %v639_v40 = vmul.f32 %v4005_v1, %v3768_v8  ;;  %v751_v11 = vadd.f32 %v747_v62, %v638_v60 }
 0x12a   : > { %v647_v1 = vmul.f32 %v4077_v10, %v3652_v20  ;;  %v994_v19 = vmul.f32 %v4083_v9, %v3691_v53 }
 0x12b   : > { %2634 = vmatmul.msk.f32.gmra.mxu2 %vm1011_vm0, %v3876_v6  ;;  %v1959_v35 = vadd.f32 %v4026_v26, %v988_v13 }
 0x12c   : > { %2624 = vmatmul.msk.f32.gmra.mxu0 %vm1011_vm0, %v3812_v61 }
 0x133   : > { %2656 = vmatmul.msk.f32.vlgmr.msrb.gmra.mxu2 %vm1011_vm0, %v3772_v15 }
 0x134   : > { %2625 = vmatmul.msk.f32.gmra.mxu0 %vm1011_vm0, %v3856_v42  ;;  %1888 = vmatpush.msrb.mxu2 %v1803_v33  ;;  %v748_v33 = vmul.f32 %v4007_v21, %v3775_v16  ;;  %v760_v21 = vmul.f32 %v4079_v49, %v3660_v28  ;;  %v2111_v28 = vstv %s2747_s18 }
 0x136   : > { %1889 = vmatpush.msrb.mxu2 %v1802_v58  ;;  %v752_v32 = vadd.f32 %v748_v33, %v639_v40  ;;  %v1958_v58 = vadd.f32 %v4026_v26, %v987_v56  ;;  %v764_v37 = vadd.f32 %v760_v21, %v647_v1  ;;  %v758_v40 = vmul.f32 %v4079_v49, %v3775_v16 }
 0x137   : > { %v875_v33 = vmul.f32 %v4081_v7, %v3780_v27  ;;  %v993_v27 = vmul.f32 %v4083_v9, %v3756_v48 }
 0x138   : > { %v869_v24 = vadd.f32 %v865_v43, %v752_v32  ;;  %v646_v43 = vmul.f32 %v4077_v10, %v3710_v5 }
 0x13a   : > { %v986_v38 = vadd.f32 %v982_v30, %v869_v24  ;;  %v763_v16 = vadd.f32 %v759_v17, %v646_v43  ;;  %v644_v24 = vmul.f32 %v4077_v10, %v3795_v50 }
 0x13b   : > { %2657 = vmatmul.msk.f32.gmra.mxu2 %vm1011_vm0, %v3812_v61 }
 0x13c   : > { %2626 = vmatmul.msk.f32.gmra.mxu0 %vm1011_vm0, %v3876_v6  ;;  %v880_v30 = vadd.f32 %v876_v44, %v763_v16 }
 0x13e   : > { %v997_v25 = vadd.f32 %v993_v27, %v880_v30 }
 0x140   : > { %v2114_v36 = vadd.f32 %v2111_v28, %v997_v25 }
 0x143   : > { %2658 = vmatmul.msk.f32.gmra.mxu2 %vm1011_vm0, %v3856_v42 }
 0x144   : > { %2648 = vmatmul.msk.f32.vlgmr.msrb.gmra.mxu0 %vm1011_vm0, %v3772_v15 }
 0x145   : > { %1818 = vmatpush.msrb.mxu0 %v1801_v57  ;;  %v1957_v57 = vadd.f32 %v4026_v26, %v986_v38 }
 0x147   : > { %1819 = vmatpush.msrb.mxu0 %v1800_v41 }
 0x14b   : > { %2659 = vmatmul.msk.f32.gmra.mxu2 %vm1011_vm0, %v3876_v6 }
 0x14c   : > { %2649 = vmatmul.msk.f32.gmra.mxu0 %vm1011_vm0, %v3812_v61 }
 0x153   : > { %2681 = vmatmul.msk.f32.vlgmr.msra.gmra.mxu2 %vm1011_vm0, %v3772_v15 }
 0x154   : > { %2650 = vmatmul.msk.f32.gmra.mxu0 %vm1011_vm0, %v3856_v42  ;;  %2044 = vmatpush.msra.mxu2 %v1959_v35 }
 0x156   : > { %v1111_v4 = vpop.f32.mrf.mxu2  ;;  %2045 = vmatpush.msra.mxu2 %v1958_v58 }
 0x157   : > { %2589 = vmatmul.msk.f32.vlgmr.msra.gmra.mxu3 %vm1011_vm0, %v1111_v4  ;;  %v864_v4 = vmul.f32 %v4009_v63, %v3815_v0  ;;  %v877_v63 = vmul.f32 %v4081_v7, %v3680_v45 }
 0x158   : > { %1461 = vmatpush.msra.mxu3 %v3960_v14 }
 0x159   : > { %v868_v3 = vadd.f32 %v864_v4, %v751_v11  ;;  %v881_v20 = vadd.f32 %v877_v63, %v764_v37 }
 0x15a   : > { %1462 = vmatpush.msra.mxu3 %v3967_v18 }
 0x15b   : > { %2682 = vmatmul.msk.f32.gmra.mxu2 %vm1011_vm0, %v3812_v61  ;;  %v985_v13 = vadd.f32 %v981_v22, %v868_v3 }
 0x15c   : > { %2651 = vmatmul.msk.f32.gmra.mxu0 %vm1011_vm0, %v3876_v6 }
 0x15d   : > { %v1956_v45 = vadd.f32 %v4026_v26, %v985_v13  ;;  %v645_v26 = vmul.f32 %v4077_v10, %v3768_v8  ;;  %v992_v8 = vmul.f32 %v4083_v9, %v3790_v39 }
 0x15e   : > { %v1114_v23 = vpop.f32.mrf.mxu2 }
 0x15f   : > { %2590 = vmatmul.msk.f32.gmra.mxu3 %vm1011_vm0, %v1114_v23  ;;  %v998_v23 = vadd.f32 %v994_v19, %v881_v20 }
 0x161   : > { %v1041_v31 = vpop.f32.mrf.mxu0  ;;  %v2115_v35 = vadd.f32 %v2111_v28, %v998_v23 }
 0x162   : > { %2581 = vmatmul.msk.f32.vlgmr.msra.gmra.mxu1 %vm1011_vm0, %v1041_v31 }
 0x163   : > { %2683 = vmatmul.msk.f32.gmra.mxu2 %vm1011_vm0, %v3856_v42  ;;  %1391 = vmatpush.msra.mxu1 %v3960_v14 }
 0x164   : > { %2673 = vmatmul.msk.f32.vlgmr.msra.gmra.mxu0 %vm1011_vm0, %v3772_v15 }
 0x165   : > { %1392 = vmatpush.msra.mxu1 %v3967_v18  ;;  %1974 = vmatpush.msra.mxu0 %v1957_v57  ;;  %v991_v57 = vmul.f32 %v4083_v9, %v3826_v2 }
 0x166   : > { %v1117_v34 = vpop.f32.mrf.mxu2 }
 0x167   : > { %2591 = vmatmul.msk.f32.gmra.mxu3 %vm1011_vm0, %v1117_v34  ;;  %1975 = vmatpush.msra.mxu0 %v1956_v45  ;;  %v762_v34 = vadd.f32 %v758_v40, %v645_v26 }
 0x169   : > { %v1044_v52 = vpop.f32.mrf.mxu0  ;;  %v879_v5 = vadd.f32 %v875_v33, %v762_v34 }
 0x16a   : > { %2582 = vmatmul.msk.f32.gmra.mxu1 %vm1011_vm0, %v1044_v52  ;;  %v757_v52 = vmul.f32 %v4079_v49, %v3806_v59 }
 0x16b   : > { %2684 = vmatmul.msk.f32.gmra.mxu2 %vm1011_vm0, %v3876_v6  ;;  %v996_v12 = vadd.f32 %v992_v8, %v879_v5 }
 0x16c   : > { %2674 = vmatmul.msk.f32.gmra.mxu0 %vm1011_vm0, %v3812_v61  ;;  %v761_v56 = vadd.f32 %v757_v52, %v644_v24 }
 0x16d   : > { %v2113_v39 = vadd.f32 %v2111_v28, %v996_v12 }
 0x16e   : > { %v1120_v47 = vpop.f32.mrf.mxu2  ;;  %v878_v58 = vadd.f32 %v874_v55, %v761_v56 }
 0x16f   : > { %2592 = vmatmul.msk.f32.gmra.mxu3 %vm1011_vm0, %v1120_v47 }
 0x170   : > { %v995_v50 = vadd.f32 %v991_v57, %v878_v58 }
 0x171   : > { %v1047_v54 = vpop.f32.mrf.mxu0 }
 0x172   : > { %2583 = vmatmul.msk.f32.gmra.mxu1 %vm1011_vm0, %v1047_v54  ;;  %v2112_v59 = vadd.f32 %v2111_v28, %v995_v50 }
 0x173   : > { %2706 = vmatmul.msk.f32.vlgmr.msrb.gmra.mxu2 %vm1011_vm0, %v3772_v15 }
 0x174   : > { %2675 = vmatmul.msk.f32.gmra.mxu0 %vm1011_vm0, %v3856_v42  ;;  %2200 = vmatpush.msrb.mxu2 %v2115_v35 }
 0x176   : > { %v1267_v29 = vpop.f32.mrf.mxu2  ;;  %2201 = vmatpush.msrb.mxu2 %v2114_v36 }
 0x177   : > { %2610 = vmatmul.msk.f32.vlgmr.msrb.gmra.mxu3 %vm1011_vm0, %v1267_v29 }
 0x178   : > { %1617 = vmatpush.msrb.mxu3 %v3960_v14 }
 0x179   : > { %v1050_v41 = vpop.f32.mrf.mxu0 }
 0x17a   : > { %2584 = vmatmul.msk.f32.gmra.mxu1 %vm1011_vm0, %v1050_v41  ;;  %1618 = vmatpush.msrb.mxu3 %v3967_v18 }
 0x17b   : > { %2707 = vmatmul.msk.f32.gmra.mxu2 %vm1011_vm0, %v3812_v61 }
 0x17c   : > { %2676 = vmatmul.msk.f32.gmra.mxu0 %vm1011_vm0, %v3876_v6 }
 0x17e   : > { %v1270_v53 = vpop.f32.mrf.mxu2 }
 0x17f   : > { %2611 = vmatmul.msk.f32.gmra.mxu3 %vm1011_vm0, %v1270_v53 }
 0x181   : > { %v1197_v31 = vpop.f32.mrf.mxu0 }
 0x182   : > { %2602 = vmatmul.msk.f32.vlgmr.msrb.gmra.mxu1 %vm1011_vm0, %v1197_v31 }
 0x183   : > { %2708 = vmatmul.msk.f32.gmra.mxu2 %vm1011_vm0, %v3856_v42  ;;  %1547 = vmatpush.msrb.mxu1 %v3960_v14 }
 0x184   : > { %2698 = vmatmul.msk.f32.vlgmr.msrb.gmra.mxu0 %vm1011_vm0, %v3772_v15 }
 0x185   : > { %1548 = vmatpush.msrb.mxu1 %v3967_v18  ;;  %2130 = vmatpush.msrb.mxu0 %v2113_v39 }
 0x186   : > { %v1273_v51 = vpop.f32.mrf.mxu2 }
 0x187   : > { %2612 = vmatmul.msk.f32.gmra.mxu3 %vm1011_vm0, %v1273_v51  ;;  %2131 = vmatpush.msrb.mxu0 %v2112_v59 }
 0x189   : > { %v1200_v32 = vpop.f32.mrf.mxu0 }
 0x18a   : > { %2603 = vmatmul.msk.f32.gmra.mxu1 %vm1011_vm0, %v1200_v32 }
 0x18b   : > { %2709 = vmatmul.msk.f32.gmra.mxu2 %vm1011_vm0, %v3876_v6 }
 0x18c   : > { %2699 = vmatmul.msk.f32.gmra.mxu0 %vm1011_vm0, %v3812_v61 }
 0x18e   : > { %v1276_v46 = vpop.f32.mrf.mxu2 }
 0x18f   : > { %2613 = vmatmul.msk.f32.gmra.mxu3 %vm1011_vm0, %v1276_v46 }
 0x191   : > { %v1203_v48 = vpop.f32.mrf.mxu0 }
 0x192   : > { %2604 = vmatmul.msk.f32.gmra.mxu1 %vm1011_vm0, %v1203_v48 }
 0x193   : > { %2731 = vmatmul.msk.f32.vlgmr.msra.gmra.mxu2 %vm1011_vm0, %v3772_v15 }
 0x194   : > { %2700 = vmatmul.msk.f32.gmra.mxu0 %vm1011_vm0, %v3856_v42 }
 0x196   : > { %v1423_v38 = vpop.f32.mrf.mxu2 }
 0x197   : > { %2635 = vmatmul.msk.f32.vlgmr.msra.gmra.mxu3 %vm1011_vm0, %v1423_v38 }
 0x198   : > { %1773 = vmatpush.msra.mxu3 %v3960_v14 }
 0x199   : > { %v1206_v47 = vpop.f32.mrf.mxu0 }
 0x19a   : > { %2605 = vmatmul.msk.f32.gmra.mxu1 %vm1011_vm0, %v1206_v47  ;;  %1774 = vmatpush.msra.mxu3 %v3967_v18 }
 0x19b   : > { %2732 = vmatmul.msk.f32.gmra.mxu2 %vm1011_vm0, %v3812_v61 }
 0x19c   : > { %2701 = vmatmul.msk.f32.gmra.mxu0 %vm1011_vm0, %v3876_v6 }
 0x19e   : > { %v1426_v0 = vpop.f32.mrf.mxu2 }
 0x19f   : > { %2636 = vmatmul.msk.f32.gmra.mxu3 %vm1011_vm0, %v1426_v0 }
 0x1a1   : > { %v1353_v2 = vpop.f32.mrf.mxu0 }
 0x1a2   : > { %2627 = vmatmul.msk.f32.vlgmr.msra.gmra.mxu1 %vm1011_vm0, %v1353_v2 }
 0x1a3   : > { %2733 = vmatmul.msk.f32.gmra.mxu2 %vm1011_vm0, %v3856_v42  ;;  %1703 = vmatpush.msra.mxu1 %v3960_v14 }
 0x1a4   : > { %2723 = vmatmul.msk.f32.vlgmr.msra.gmra.mxu0 %vm1011_vm0, %v3772_v15 }
 0x1a5   : > { %1704 = vmatpush.msra.mxu1 %v3967_v18 }
 0x1a6   : > { %v1429_v54 = vpop.f32.mrf.mxu2 }
 0x1a7   : > { %2637 = vmatmul.msk.f32.gmra.mxu3 %vm1011_vm0, %v1429_v54 }
 0x1a9   : > { %v1356_v60 = vpop.f32.mrf.mxu0 }
 0x1aa   : > { %2628 = vmatmul.msk.f32.gmra.mxu1 %vm1011_vm0, %v1356_v60 }
 0x1ab   : > { %2734 = vmatmul.msk.f32.gmra.mxu2 %vm1011_vm0, %v3876_v6 }
 0x1ac   : > { %2724 = vmatmul.msk.f32.gmra.mxu0 %vm1011_vm0, %v3812_v61 }
 0x1ae   : > { %v1432_v62 = vpop.f32.mrf.mxu2 }
 0x1af   : > { %2638 = vmatmul.msk.f32.gmra.mxu3 %vm1011_vm0, %v1432_v62 }
 0x1b1   : > { %v1359_v4 = vpop.f32.mrf.mxu0 }
 0x1b2   : > { %2629 = vmatmul.msk.f32.gmra.mxu1 %vm1011_vm0, %v1359_v4 }
 0x1b3   : > { %2756 = vmatmul.msk.f32.vlgmr.msrb.gmra.mxu2 %vm1011_vm0, %v3772_v15 }
 0x1b4   : > { %2725 = vmatmul.msk.f32.gmra.mxu0 %vm1011_vm0, %v3856_v42 }
 0x1b6   : > { %v1579_v22 = vpop.f32.mrf.mxu2 }
 0x1b7   : > { %2660 = vmatmul.msk.f32.vlgmr.msrb.gmra.mxu3 %vm1011_vm0, %v1579_v22 }
 0x1b8   : > { %1929 = vmatpush.msrb.mxu3 %v3960_v14 }
 0x1b9   : > { %v1362_v10 = vpop.f32.mrf.mxu0 }
 0x1ba   : > { %2630 = vmatmul.msk.f32.gmra.mxu1 %vm1011_vm0, %v1362_v10  ;;  %1930 = vmatpush.msrb.mxu3 %v3967_v18 }
 0x1bb   : > { %2757 = vmatmul.msk.f32.gmra.mxu2 %vm1011_vm0, %v3812_v61 }
 0x1bc   : > { %2726 = vmatmul.msk.f32.gmra.mxu0 %vm1011_vm0, %v3876_v6 }
 0x1be   : > { %v1582_v49 = vpop.f32.mrf.mxu2 }
 0x1bf   : > { %2661 = vmatmul.msk.f32.gmra.mxu3 %vm1011_vm0, %v1582_v49 }
 0x1c1   : > { %v1509_v7 = vpop.f32.mrf.mxu0 }
 0x1c2   : > { %2652 = vmatmul.msk.f32.vlgmr.msrb.gmra.mxu1 %vm1011_vm0, %v1509_v7 }
 0x1c3   : > { %2758 = vmatmul.msk.f32.gmra.mxu2 %vm1011_vm0, %v3856_v42  ;;  %1859 = vmatpush.msrb.mxu1 %v3960_v14 }
 0x1c4   : > { %2748 = vmatmul.msk.f32.vlgmr.msrb.gmra.mxu0 %vm1011_vm0, %v3772_v15 }
 0x1c5   : > { %1860 = vmatpush.msrb.mxu1 %v3967_v18 }
 0x1c6   : > { %v1585_v9 = vpop.f32.mrf.mxu2 }
 0x1c7   : > { %2662 = vmatmul.msk.f32.gmra.mxu3 %vm1011_vm0, %v1585_v9 }
 0x1c9   : > { %v1512_v29 = vpop.f32.mrf.mxu0 }
 0x1ca   : > { %2653 = vmatmul.msk.f32.gmra.mxu1 %vm1011_vm0, %v1512_v29 }
 0x1cb   : > { %2759 = vmatmul.msk.f32.gmra.mxu2 %vm1011_vm0, %v3876_v6 }
 0x1cc   : > { %2749 = vmatmul.msk.f32.gmra.mxu0 %vm1011_vm0, %v3812_v61 }
 0x1ce   : > { %v1588_v11 = vpop.f32.mrf.mxu2 }
 0x1cf   : > { %2663 = vmatmul.msk.f32.gmra.mxu3 %vm1011_vm0, %v1588_v11 }
 0x1d1   : > { %v1515_v1 = vpop.f32.mrf.mxu0 }
 0x1d2   : > { %2654 = vmatmul.msk.f32.gmra.mxu1 %vm1011_vm0, %v1515_v1 }
 0x1d4   : > { %2750 = vmatmul.msk.f32.gmra.mxu0 %vm1011_vm0, %v3856_v42 }
 0x1d6   : > { %v1735_v15 = vpop.f32.mrf.mxu2 }
 0x1d7   : > { %2685 = vmatmul.msk.f32.vlgmr.msra.gmra.mxu3 %vm1011_vm0, %v1735_v15 }
 0x1d8   : > { %2085 = vmatpush.msra.mxu3 %v3960_v14 }
 0x1d9   : > { %v1518_v21 = vpop.f32.mrf.mxu0 }
 0x1da   : > { %2655 = vmatmul.msk.f32.gmra.mxu1 %vm1011_vm0, %v1518_v21  ;;  %v1152_v61 = vpop.f32.mrf.mxu3  ;;  %2086 = vmatpush.msra.mxu3 %v3967_v18 }
 0x1db   : > { %2593 = vst.msk [vmem:[%s4205_s28 + $0x20] sm:$0xff] %vm1164_vm9, %v1152_v61 }
 0x1dc   : > { %2751 = vmatmul.msk.f32.gmra.mxu0 %vm1011_vm0, %v3876_v6 }
 0x1de   : > { %v1738_v42 = vpop.f32.mrf.mxu2 }
 0x1df   : > { %v1082_v63 = vpop.f32.mrf.mxu1  ;;  %2686 = vmatmul.msk.f32.gmra.mxu3 %vm1011_vm0, %v1738_v42 }
 0x1e0   : > { %1165 = vst.msk [vmem:[%s4205_s28] sm:$0xff] %vm1164_vm9, %v1082_v63 }
 0x1e1   : > { %v1665_v3 = vpop.f32.mrf.mxu0 }
 0x1e2   : > { %2677 = vmatmul.msk.f32.vlgmr.msra.gmra.mxu1 %vm1011_vm0, %v1665_v3  ;;  %v1155_v37 = vpop.f32.mrf.mxu3 }
 0x1e3   : > { %2594 = vst.msk [vmem:[%s4205_s28 + $0x28] sm:$0xff] %vm1164_vm9, %v1155_v37  ;;  %2015 = vmatpush.msra.mxu1 %v3960_v14 }
 0x1e5   : > { %2016 = vmatpush.msra.mxu1 %v3967_v18 }
 0x1e6   : > { %v1741_v6 = vpop.f32.mrf.mxu2 }
 0x1e7   : > { %v1085_v19 = vpop.f32.mrf.mxu1  ;;  %2687 = vmatmul.msk.f32.gmra.mxu3 %vm1011_vm0, %v1741_v6 }
 0x1e8   : > { %1166 = vst.msk [vmem:[%s4205_s28 + $0x8] sm:$0xff] %vm1164_vm9, %v1085_v19 }
 0x1e9   : > { %v1668_v41 = vpop.f32.mrf.mxu0 }
 0x1ea   : > { %2678 = vmatmul.msk.f32.gmra.mxu1 %vm1011_vm0, %v1668_v41  ;;  %v1158_v13 = vpop.f32.mrf.mxu3 }
 0x1eb   : > { %2595 = vst.msk [vmem:[%s4205_s28 + $0x30] sm:$0xff] %vm1164_vm9, %v1158_v13 }
 0x1ee   : > { %v1744_v20 = vpop.f32.mrf.mxu2 }
 0x1ef   : > { %v1088_v28 = vpop.f32.mrf.mxu1  ;;  %2688 = vmatmul.msk.f32.gmra.mxu3 %vm1011_vm0, %v1744_v20 }
 0x1f0   : > { %1167 = vst.msk [vmem:[%s4205_s28 + $0x10] sm:$0xff] %vm1164_vm9, %v1088_v28 }
 0x1f1   : > { %v1671_v45 = vpop.f32.mrf.mxu0 }
 0x1f2   : > { %2679 = vmatmul.msk.f32.gmra.mxu1 %vm1011_vm0, %v1671_v45  ;;  %v1161_v23 = vpop.f32.mrf.mxu3 }
 0x1f3   : > { %2596 = vst.msk [vmem:[%s4205_s28 + $0x38] sm:$0xff] %vm1164_vm9, %v1161_v23 }
 0x1f6   : > { %v1891_v53 = vpop.f32.mrf.mxu2 }
 0x1f7   : > { %v1091_v35 = vpop.f32.mrf.mxu1  ;;  %2710 = vmatmul.msk.f32.vlgmr.msrb.gmra.mxu3 %vm1011_vm0, %v1891_v53 }
 0x1f8   : > { %1168 = vst.msk [vmem:[%s4205_s28 + $0x18] sm:$0xff] %vm1164_vm9, %v1091_v35  ;;  %2241 = vmatpush.msrb.mxu3 %v3960_v14 }
 0x1f9   : > { %v1674_v31 = vpop.f32.mrf.mxu0 }
 0x1fa   : > { %2680 = vmatmul.msk.f32.gmra.mxu1 %vm1011_vm0, %v1674_v31  ;;  %v1308_v26 = vpop.f32.mrf.mxu3  ;;  %2242 = vmatpush.msrb.mxu3 %v3967_v18 }
 0x1fb   : > { %2618 = vst.msk [vmem:[%s4205_s28 + $0x60] sm:$0xff] %vm1164_vm9, %v1308_v26 }
 0x1fe   : > { %v1894_v40 = vpop.f32.mrf.mxu2 }
 0x1ff   : > { %v1238_v33 = vpop.f32.mrf.mxu1  ;;  %2711 = vmatmul.msk.f32.gmra.mxu3 %vm1011_vm0, %v1894_v40 }
 0x200   : > { %2614 = vst.msk [vmem:[%s4205_s28 + $0x40] sm:$0xff] %vm1164_vm9, %v1238_v33 }
 0x201   : > { %v1821_v43 = vpop.f32.mrf.mxu0 }
 0x202   : > { %2702 = vmatmul.msk.f32.vlgmr.msrb.gmra.mxu1 %vm1011_vm0, %v1821_v43  ;;  %v1311_v17 = vpop.f32.mrf.mxu3 }
 0x203   : > { %2619 = vst.msk [vmem:[%s4205_s28 + $0x68] sm:$0xff] %vm1164_vm9, %v1311_v17  ;;  %2171 = vmatpush.msrb.mxu1 %v3960_v14 }
 0x205   : > { %2172 = vmatpush.msrb.mxu1 %v3967_v18 }
 0x206   : > { %v1897_v44 = vpop.f32.mrf.mxu2 }
 0x207   : > { %v1241_v51 = vpop.f32.mrf.mxu1  ;;  %2712 = vmatmul.msk.f32.gmra.mxu3 %vm1011_vm0, %v1897_v44 }
 0x208   : > { %2615 = vst.msk [vmem:[%s4205_s28 + $0x48] sm:$0xff] %vm1164_vm9, %v1241_v51 }
 0x209   : > { %v1824_v34 = vpop.f32.mrf.mxu0 }
 0x20a   : > { %2703 = vmatmul.msk.f32.gmra.mxu1 %vm1011_vm0, %v1824_v34  ;;  %v1314_v8 = vpop.f32.mrf.mxu3 }
 0x20b   : > { %2620 = vst.msk [vmem:[%s4205_s28 + $0x70] sm:$0xff] %vm1164_vm9, %v1314_v8 }
 0x20e   : > { %v1900_v16 = vpop.f32.mrf.mxu2 }
 0x20f   : > { %v1244_v27 = vpop.f32.mrf.mxu1  ;;  %2713 = vmatmul.msk.f32.gmra.mxu3 %vm1011_vm0, %v1900_v16 }
 0x210   : > { %2616 = vst.msk [vmem:[%s4205_s28 + $0x50] sm:$0xff] %vm1164_vm9, %v1244_v27 }
 0x211   : > { %v1827_v14 = vpop.f32.mrf.mxu0 }
 0x212   : > { %2704 = vmatmul.msk.f32.gmra.mxu1 %vm1011_vm0, %v1827_v14  ;;  %v1317_v18 = vpop.f32.mrf.mxu3 }
 0x213   : > { %2621 = vst.msk [vmem:[%s4205_s28 + $0x78] sm:$0xff] %vm1164_vm9, %v1317_v18 }
 0x216   : > { %v2047_v5 = vpop.f32.mrf.mxu2 }
 0x217   : > { %v1247_v32 = vpop.f32.mrf.mxu1  ;;  %2735 = vmatmul.msk.f32.vlgmr.msra.gmra.mxu3 %vm1011_vm0, %v2047_v5 }
 0x218   : > { %2617 = vst.msk [vmem:[%s4205_s28 + $0x58] sm:$0xff] %vm1164_vm9, %v1247_v32 }
 0x219   : > { %v1830_v30 = vpop.f32.mrf.mxu0 }
 0x21a   : > { %2705 = vmatmul.msk.f32.gmra.mxu1 %vm1011_vm0, %v1830_v30  ;;  %v1464_v12 = vpop.f32.mrf.mxu3 }
 0x21b   : > { %2643 = vst.msk [vmem:[%s4205_s28 + $0xa0] sm:$0xff] %vm1164_vm9, %v1464_v12 }
 0x21e   : > { %v2050_v25 = vpop.f32.mrf.mxu2 }
 0x21f   : > { %v1394_v39 = vpop.f32.mrf.mxu1  ;;  %2736 = vmatmul.msk.f32.gmra.mxu3 %vm1011_vm0, %v2050_v25 }
 0x220   : > { %2639 = vst.msk [vmem:[%s4205_s28 + $0x80] sm:$0xff] %vm1164_vm9, %v1394_v39 }
 0x221   : > { %v1977_v36 = vpop.f32.mrf.mxu0 }
 0x222   : > { %2727 = vmatmul.msk.f32.vlgmr.msra.gmra.mxu1 %vm1011_vm0, %v1977_v36  ;;  %v1467_v46 = vpop.f32.mrf.mxu3 }
 0x223   : > { %2644 = vst.msk [vmem:[%s4205_s28 + $0xa8] sm:$0xff] %vm1164_vm9, %v1467_v46 }
 0x226   : > { %v2053_v48 = vpop.f32.mrf.mxu2 }
 0x227   : > { %v1397_v24 = vpop.f32.mrf.mxu1  ;;  %2737 = vmatmul.msk.f32.gmra.mxu3 %vm1011_vm0, %v2053_v48 }
 0x228   : > { %2640 = vst.msk [vmem:[%s4205_s28 + $0x88] sm:$0xff] %vm1164_vm9, %v1397_v24 }
 0x229   : > { %v1980_v52 = vpop.f32.mrf.mxu0 }
 0x22a   : > { %2728 = vmatmul.msk.f32.gmra.mxu1 %vm1011_vm0, %v1980_v52  ;;  %v1470_v55 = vpop.f32.mrf.mxu3 }
 0x22b   : > { %2645 = vst.msk [vmem:[%s4205_s28 + $0xb0] sm:$0xff] %vm1164_vm9, %v1470_v55 }
 0x22e   : > { %v2056_v38 = vpop.f32.mrf.mxu2 }
 0x22f   : > { %v1400_v56 = vpop.f32.mrf.mxu1  ;;  %2738 = vmatmul.msk.f32.gmra.mxu3 %vm1011_vm0, %v2056_v38 }
 0x230   : > { %2641 = vst.msk [vmem:[%s4205_s28 + $0x90] sm:$0xff] %vm1164_vm9, %v1400_v56 }
 0x231   : > { %v1983_v57 = vpop.f32.mrf.mxu0 }
 0x232   : > { %2729 = vmatmul.msk.f32.gmra.mxu1 %vm1011_vm0, %v1983_v57  ;;  %v1473_v58 = vpop.f32.mrf.mxu3 }
 0x233   : > { %2646 = vst.msk [vmem:[%s4205_s28 + $0xb8] sm:$0xff] %vm1164_vm9, %v1473_v58 }
 0x236   : > { %v2203_v47 = vpop.f32.mrf.mxu2 }
 0x237   : > { %v1403_v50 = vpop.f32.mrf.mxu1  ;;  %2760 = vmatmul.msk.f32.vlgmr.msrb.gmra.mxu3 %vm1011_vm0, %v2203_v47 }
 0x238   : > { %2642 = vst.msk [vmem:[%s4205_s28 + $0x98] sm:$0xff] %vm1164_vm9, %v1403_v50 }
 0x239   : > { %v1986_v59 = vpop.f32.mrf.mxu0 }
 0x23a   : > { %2730 = vmatmul.msk.f32.gmra.mxu1 %vm1011_vm0, %v1986_v59  ;;  %v1620_v0 = vpop.f32.mrf.mxu3 }
 0x23b   : > { %2668 = vst.msk [vmem:[%s4205_s28 + $0xe0] sm:$0xff] %vm1164_vm9, %v1620_v0 }
 0x23e   : > { %v2206_v2 = vpop.f32.mrf.mxu2 }
 0x23f   : > { %v1550_v54 = vpop.f32.mrf.mxu1  ;;  %2761 = vmatmul.msk.f32.gmra.mxu3 %vm1011_vm0, %v2206_v2 }
 0x240   : > { %2664 = vst.msk [vmem:[%s4205_s28 + $0xc0] sm:$0xff] %vm1164_vm9, %v1550_v54 }
 0x241   : > { %v2133_v60 = vpop.f32.mrf.mxu0 }
 0x242   : > { %2752 = vmatmul.msk.f32.vlgmr.msrb.gmra.mxu1 %vm1011_vm0, %v2133_v60  ;;  %v1623_v62 = vpop.f32.mrf.mxu3 }
 0x243   : > { %2669 = vst.msk [vmem:[%s4205_s28 + $0xe8] sm:$0xff] %vm1164_vm9, %v1623_v62 }
 0x246   : > { %v2209_v4 = vpop.f32.mrf.mxu2 }
 0x247   : > { %v1553_v22 = vpop.f32.mrf.mxu1  ;;  %2762 = vmatmul.msk.f32.gmra.mxu3 %vm1011_vm0, %v2209_v4 }
 0x248   : > { %2665 = vst.msk [vmem:[%s4205_s28 + $0xc8] sm:$0xff] %vm1164_vm9, %v1553_v22 }
 0x249   : > { %v2136_v10 = vpop.f32.mrf.mxu0 }
 0x24a   : > { %2753 = vmatmul.msk.f32.gmra.mxu1 %vm1011_vm0, %v2136_v10  ;;  %v1626_v49 = vpop.f32.mrf.mxu3 }
 0x24b   : > { %2670 = vst.msk [vmem:[%s4205_s28 + $0xf0] sm:$0xff] %vm1164_vm9, %v1626_v49 }
 0x24e   : > { %v2212_v7 = vpop.f32.mrf.mxu2 }
 0x24f   : > { %v1556_v9 = vpop.f32.mrf.mxu1  ;;  %2763 = vmatmul.msk.f32.gmra.mxu3 %vm1011_vm0, %v2212_v7 }
 0x250   : > { %2666 = vst.msk [vmem:[%s4205_s28 + $0xd0] sm:$0xff] %vm1164_vm9, %v1556_v9 }
 0x251   : > { %v2139_v29 = vpop.f32.mrf.mxu0 }
 0x252   : > { %2754 = vmatmul.msk.f32.gmra.mxu1 %vm1011_vm0, %v2139_v29  ;;  %v1629_v11 = vpop.f32.mrf.mxu3 }
 0x253   : > { %2671 = vst.msk [vmem:[%s4205_s28 + $0xf8] sm:$0xff] %vm1164_vm9, %v1629_v11 }
 0x257   : > { %v1559_v1 = vpop.f32.mrf.mxu1 }
 0x258   : > { %2667 = vst.msk [vmem:[%s4205_s28 + $0xd8] sm:$0xff] %vm1164_vm9, %v1559_v1 }
 0x259   : > { %v2142_v15 = vpop.f32.mrf.mxu0 }
 0x25a   : > { %2755 = vmatmul.msk.f32.gmra.mxu1 %vm1011_vm0, %v2142_v15  ;;  %v1776_v21 = vpop.f32.mrf.mxu3 }
 0x25b   : > { %2693 = vst.msk [vmem:[%s4205_s28 + $0x120] sm:$0xff] %vm1164_vm9, %v1776_v21 }
 0x25f   : > { %v1706_v61 = vpop.f32.mrf.mxu1 }
 0x260   : > { %2689 = vst.msk [vmem:[%s4205_s28 + $0x100] sm:$0xff] %vm1164_vm9, %v1706_v61 }
 0x262   : > { %v1779_v42 = vpop.f32.mrf.mxu3 }
 0x263   : > { %2694 = vst.msk [vmem:[%s4205_s28 + $0x128] sm:$0xff] %vm1164_vm9, %v1779_v42 }
 0x267   : > { %v1709_v63 = vpop.f32.mrf.mxu1 }
 0x268   : > { %2690 = vst.msk [vmem:[%s4205_s28 + $0x108] sm:$0xff] %vm1164_vm9, %v1709_v63 }
 0x26a   : > { %v1782_v3 = vpop.f32.mrf.mxu3 }
 0x26b   : > { %2695 = vst.msk [vmem:[%s4205_s28 + $0x130] sm:$0xff] %vm1164_vm9, %v1782_v3 }
 0x26f   : > { %v1712_v37 = vpop.f32.mrf.mxu1 }
 0x270   : > { %2691 = vst.msk [vmem:[%s4205_s28 + $0x110] sm:$0xff] %vm1164_vm9, %v1712_v37 }
 0x272   : > { %v1785_v6 = vpop.f32.mrf.mxu3 }
 0x273   : > { %2696 = vst.msk [vmem:[%s4205_s28 + $0x138] sm:$0xff] %vm1164_vm9, %v1785_v6 }
 0x277   : > { %v1715_v19 = vpop.f32.mrf.mxu1 }
 0x278   : > { %2692 = vst.msk [vmem:[%s4205_s28 + $0x118] sm:$0xff] %vm1164_vm9, %v1715_v19 }
 0x27a   : > { %v1932_v41 = vpop.f32.mrf.mxu3 }
 0x27b   : > { %2718 = vst.msk [vmem:[%s4205_s28 + $0x160] sm:$0xff] %vm1164_vm9, %v1932_v41 }
 0x27f   : > { %v1862_v13 = vpop.f32.mrf.mxu1 }
 0x280   : > { %2714 = vst.msk [vmem:[%s4205_s28 + $0x140] sm:$0xff] %vm1164_vm9, %v1862_v13 }
 0x282   : > { %v1935_v20 = vpop.f32.mrf.mxu3 }
 0x283   : > { %2719 = vst.msk [vmem:[%s4205_s28 + $0x168] sm:$0xff] %vm1164_vm9, %v1935_v20 }
 0x287   : > { %v1865_v28 = vpop.f32.mrf.mxu1 }
 0x288   : > { %2715 = vst.msk [vmem:[%s4205_s28 + $0x148] sm:$0xff] %vm1164_vm9, %v1865_v28 }
 0x28a   : > { %v1938_v45 = vpop.f32.mrf.mxu3 }
 0x28b   : > { %2720 = vst.msk [vmem:[%s4205_s28 + $0x170] sm:$0xff] %vm1164_vm9, %v1938_v45 }
 0x28f   : > { %v1868_v23 = vpop.f32.mrf.mxu1 }
 0x290   : > { %2716 = vst.msk [vmem:[%s4205_s28 + $0x150] sm:$0xff] %vm1164_vm9, %v1868_v23 }
 0x292   : > { %v1941_v53 = vpop.f32.mrf.mxu3 }
 0x293   : > { %2721 = vst.msk [vmem:[%s4205_s28 + $0x178] sm:$0xff] %vm1164_vm9, %v1941_v53 }
 0x297   : > { %v1871_v35 = vpop.f32.mrf.mxu1 }
 0x298   : > { %2717 = vst.msk [vmem:[%s4205_s28 + $0x158] sm:$0xff] %vm1164_vm9, %v1871_v35 }
 0x29a   : > { %v2088_v31 = vpop.f32.mrf.mxu3 }
 0x29b   : > { %2743 = vst.msk [vmem:[%s4205_s28 + $0x1a0] sm:$0xff] %vm1164_vm9, %v2088_v31 }
 0x29f   : > { %v2018_v26 = vpop.f32.mrf.mxu1 }
 0x2a0   : > { %2739 = vst.msk [vmem:[%s4205_s28 + $0x180] sm:$0xff] %vm1164_vm9, %v2018_v26 }
 0x2a2   : > { %v2091_v40 = vpop.f32.mrf.mxu3 }
 0x2a3   : > { %2744 = vst.msk [vmem:[%s4205_s28 + $0x1a8] sm:$0xff] %vm1164_vm9, %v2091_v40 }
 0x2a7   : > { %v2021_v33 = vpop.f32.mrf.mxu1 }
 0x2a8   : > { %2740 = vst.msk [vmem:[%s4205_s28 + $0x188] sm:$0xff] %vm1164_vm9, %v2021_v33 }
 0x2aa   : > { %v2094_v43 = vpop.f32.mrf.mxu3 }
 0x2ab   : > { %2745 = vst.msk [vmem:[%s4205_s28 + $0x1b0] sm:$0xff] %vm1164_vm9, %v2094_v43 }
 0x2af   : > { %v2024_v17 = vpop.f32.mrf.mxu1 }
 0x2b0   : > { %2741 = vst.msk [vmem:[%s4205_s28 + $0x190] sm:$0xff] %vm1164_vm9, %v2024_v17 }
 0x2b2   : > { %v2097_v44 = vpop.f32.mrf.mxu3 }
 0x2b3   : > { %2746 = vst.msk [vmem:[%s4205_s28 + $0x1b8] sm:$0xff] %vm1164_vm9, %v2097_v44 }
 0x2b7   : > { %v2027_v51 = vpop.f32.mrf.mxu1 }
 0x2b8   : > { %2742 = vst.msk [vmem:[%s4205_s28 + $0x198] sm:$0xff] %vm1164_vm9, %v2027_v51 }
 0x2ba   : > { %v2244_v34 = vpop.f32.mrf.mxu3 }
 0x2bb   : > { %2768 = vst.msk [vmem:[%s4205_s28 + $0x1e0] sm:$0xff] %vm1164_vm9, %v2244_v34 }
 0x2bf   : > { %v2174_v8 = vpop.f32.mrf.mxu1 }
 0x2c0   : > { %2764 = vst.msk [vmem:[%s4205_s28 + $0x1c0] sm:$0xff] %vm1164_vm9, %v2174_v8 }
 0x2c2   : > { %v2247_v16 = vpop.f32.mrf.mxu3 }
 0x2c3   : > { %2769 = vst.msk [vmem:[%s4205_s28 + $0x1e8] sm:$0xff] %vm1164_vm9, %v2247_v16 }
 0x2c7   : > { %v2177_v27 = vpop.f32.mrf.mxu1 }
 0x2c8   : > { %2765 = vst.msk [vmem:[%s4205_s28 + $0x1c8] sm:$0xff] %vm1164_vm9, %v2177_v27 }
 0x2ca   : > { %v2250_v14 = vpop.f32.mrf.mxu3 }
 0x2cb   : > { %2770 = vst.msk [vmem:[%s4205_s28 + $0x1f0] sm:$0xff] %vm1164_vm9, %v2250_v14 }
 0x2cf   : > { %v2180_v18 = vpop.f32.mrf.mxu1 }
 0x2d0   : > { %2766 = vst.msk [vmem:[%s4205_s28 + $0x1d0] sm:$0xff] %vm1164_vm9, %v2180_v18 }
 0x2d2   : > { %v2253_v5 = vpop.f32.mrf.mxu3 }
 0x2d3   : > { %2771 = vst.msk [vmem:[%s4205_s28 + $0x1f8] sm:$0xff] %vm1164_vm9, %v2253_v5 }
 0x2d7   : > { %v2183_v32 = vpop.f32.mrf.mxu1 }
 0x2d8   : > { %2767 = vst.msk [vmem:[%s4205_s28 + $0x1d8] sm:$0xff] %vm1164_vm9, %v2183_v32 }
 0x2d9   : > { %s4531_s4 = sld [smem:[#allocation38_spill]]  ;;  %s2292_s30 = sshll.u32 %s4205_s28, 4  ;;  %s2293_s30 = int_to_ptr.vmem [resolvable:$true] %s2292_s30 }
 0x2da   : > { %s4532_s15 = sld [smem:[#allocation39_spill]]  ;;  %s3253_s19 = smov 1024  }
 0x2db   : > { %s4534_s17 = sld [smem:[#allocation55_spill]]  ;;  %s3254_s7 = smov 8192  }
 0x2dc   : > { %2823 = sst [smem:[#allocation23]] (%p3472_p13), %s3253_s19  ;;  %s3255_s22 = smov 8  }
 0x2dd   : > { %2824 = sst [smem:[#allocation23 + $0x1]] (%p3472_p13), %s3254_s7  ;;  %s3256_s11 = smov 128  }
 0x2de   : > { %2825 = sst [smem:[#allocation23 + $0x2]] (%p3472_p13), %s3255_s22  ;;  %s3257_s18 = smov [#allocation22]  }
 0x2df   : > { %s2779_s23 = sshll.u32 %s4531_s4, 3  ;;  %2826 = sst [smem:[#allocation23 + $0x3]] (%p3472_p13), %s3256_s11 }
 0x2e0   : > { %s2775_s3 = sshll.u32 %s4532_s15, 9  ;;  %2827 = sst [smem:[#allocation23 + $0x4]] (%p3472_p13), %s3256_s11 }
 0x2e1   : > { %s2279_s2 = sadd.s32 %s2779_s23, %s2775_s3  ;;  %2828 = sst [smem:[#allocation23 + $0x5]] (%p3472_p13), %s3255_s22 }
 0x2e2   : > { %s2776_s24 = sshll.u32 %s2279_s2, 3  ;;  %s3258_s25 = smov 0  }
 0x2e3   : > { %s2281_s20 = scalar_lea.hbm %s4534_s17, %s2776_s24 }
 0x2e4   : > { %s2294_s21 = sshll.u32 %s2281_s20, 4  ;;  %s2295_s21 = int_to_ptr.hbm [resolvable:$true] %s2294_s21 }
 0x2e5   : > { %2829 = dma.general (%p3472_p13), %s2293_s30, 8192, %s2295_s21, %s2267_s27, %s3257_s18, [#allocation23], %s3258_s25, 0  }
 0x2e6 PF: > { %s4535_s28 = sld [smem:[#allocation35_spill]]  ;;  %p2856_p0 = scmp.ge.s32.totalorder %s3227_s14, 2 }
 0x2e8   : > { %p2845_p8 = pnand %p2856_p0, %p3483_p10 }
 0x2ea   : > { %p2846_p3 = pneg %p2845_p8 }
 0x2ec   : > { %s2322_s15 = sand.u32 1, %s4535_s28  }
 0x2ed   : > { %s2323_s23 = scalar_lea.sflag [#allocation4], %s2322_s15 }
 0x2ee   : > { %3170 = dma.done.wait (%p2846_p3), %s2323_s23, 8192  }
 0x2ef   : > { %3172 = vsyncadd (%p2846_p3), %s2323_s23, 4294959104  ;;  %s29_s14 = sadd.s32 1, %s3227_s14   ;;  %s4538_s24 = sld [smem:[#allocation34_spill]] }
 0x2f0   : > { %p4400_p2 = scmp.ge.s32.totalorder %s29_s14, 18   ;;  %s4539_s27 = sld [smem:[#allocation50_spill]] }
 0x2f1   : > { %s4540_s10 = sld [smem:[#allocation36_spill]]  ;;  %s4546_s25 = smov %s3183_s26 }
 0x2f2   : > { %s4541_s2 = sld [smem:[#allocation45_spill]]  ;;  %s4549_s28 = smov %s3195_s29 }
 0x2f3   : > { %s4542_s30 = sld [smem:[#allocation37_spill]]  ;;  %s4551_s8 = smov %s3207_s9 }
 0x2f4   : > { %s4543_s16 = sld [smem:[#allocation43_spill]]  ;;  %s4554_s11 = smov %s3223_s13 }
 0x2f5   : > { %s4544_s17 = sld [smem:[#allocation41_spill]] }
 0x2f6   : > { %s4545_s20 = sld [smem:[#allocation42_spill]]  ;;  %s4547_s26 = smov %s4539_s27 }
 0x2f7   : > { %s4548_s27 = smov %s4540_s10  ;;  %s4553_s10 = smov %s3219_s12 }
 0x2f8   : > { %s4550_s29 = smov %s4541_s2  ;;  %28 = sbr.rel (!%p4400_p2) target bundleno = 20 (0x14), region = 179 }
 0x2fa   : > { %s4552_s9 = smov %s4543_s16 }
 0x2fb   : > { %s4555_s12 = smov %s4544_s17 }
 0x2fc   : > { %s4556_s13 = smov %s4545_s20 }
 0x2fd   :  { %2329 = vsyncpa [#allocation3], 1 }
 0x2fe   :  { %2331 = vsyncpa [#allocation3 + $0x1], 1 }
 0x2ff   :  { %2332 = vsyncpa [#allocation8], 1 }
 0x300   :  { %2334 = vsyncpa [#allocation8 + $0x1], 1 }
 0x301   :  { %2335 = vsyncpa [#allocation11], 1 }
 0x302   :  { %2336 = vsyncpa [#allocation4], 1 }
 0x303   :  { %2338 = vsyncpa [#allocation4 + $0x1], 1 }
 0x304   :  { %2339 = vsyncpa [#allocation5], 1 }
 0x305   :  { %2341 = vsyncpa [#allocation5 + $0x1], 1 }
 0x306   :  { %2342 = vsyncpa [#allocation6], 1 }
 0x307   :  { %2344 = vsyncpa [#allocation6 + $0x1], 1 }

</bundles_post_ra>
